<compile_context>
chip_gen: v5e
topology: v5e:2x2
jax: 0.10.0
libtpu: 0.0.40
codegen_flags: <defaults>
</compile_context>

<pallas_src>
import functools

import jax
import jax.numpy as jnp
from jax.experimental import pallas as pl
from jax.experimental.pallas import tpu as pltpu


FP = 128   # padded lane width for node features and per-kernel outputs


# --------------------------- shared layer math ------------------------------ #
# Used both inside the Pallas kernel (on arrays loaded from refs) and by the
# precision-matched pure-JAX reference, so the kernel is verified exactly.

def _monet_layers(h, pseudo, src, dstT, wp, bp, gA, gB, gc, wfc, bias,
                  *, n_layers, n_kernels, out_pad):
    n_edges = pseudo.shape[0]
    for l in range(n_layers):
        # pseudo_proj: Linear(2, dim) + Tanh   (tiny, f32)
        u = jnp.tanh(
            jnp.dot(pseudo, wp[l], preferred_element_type=jnp.float32) + bp[l])

        # closed-form Gaussian mixture weights: one [E,dim]@[dim,K] matmul + exp
        logit = (jnp.dot(u, gB[l], preferred_element_type=jnp.float32)
                 - 0.5 * jnp.dot(u * u, gA[l], preferred_element_type=jnp.float32)
                 - gc[l])
        g = jnp.exp(logit)                                          # [E, K]

        # node projection + src gather (bf16 MXU operands, f32 accumulation)
        fc_h = jnp.dot(h.astype(jnp.bfloat16), wfc[l],
                       preferred_element_type=jnp.float32)          # [N, K*out_pad]
        fc_src = jnp.dot(src, fc_h.astype(jnp.bfloat16),
                         preferred_element_type=jnp.float32)        # [E, K*out_pad]

        # kernel mixing — fc_src slices are 128-lane aligned tile views
        weighted = jnp.zeros((n_edges, out_pad), jnp.float32)
        for k in range(n_kernels):
            weighted = weighted + g[:, k:k + 1] * \
                fc_src[:, k * out_pad:(k + 1) * out_pad]            # [E, out_pad]

        # sum-aggregate onto destination nodes + bias
        h = jnp.dot(dstT, weighted.astype(jnp.bfloat16),
                    preferred_element_type=jnp.float32) + bias[l]   # [N, out_pad]
        # dropout between layers: identity (inference)
    return h


# ------------------------------ Pallas kernel ------------------------------- #

def monet_kernel(h_ref, pseudo_ref, src_ref, dstT_ref,
                 wp_ref, bp_ref, ga_ref, gb_ref, gc_ref, wfc_ref, bias_ref,
                 out_ref, *, n_layers, n_kernels, out_pad):
    out_ref[...] = _monet_layers(
        h_ref[...], pseudo_ref[...], src_ref[...], dstT_ref[...],
        wp_ref[...], bp_ref[...], ga_ref[...], gb_ref[...], gc_ref[...],
        wfc_ref[...], bias_ref[...],
        n_layers=n_layers, n_kernels=n_kernels, out_pad=out_pad)


# ---------------------- parameter packing (wrapper side) -------------------- #

def pack_params(layer_params, layer_dims, n_kernels):
    """Pad + stack per-layer params; precompute Gaussian constants."""
    wps, bps, gAs, gBs, gcs, wfcs, biases = [], [], [], [], [], [], []
    for p, (fi, fo) in zip(layer_params, layer_dims):
        wps.append(p["wp"])                                   # [2, dim]
        bps.append(p["bp"])                                   # [1, dim]
        isig2 = p["inv_sigma"] ** 2                           # [K, dim]
        gAs.append(isig2.T)                                   # [dim, K]
        gBs.append((p["mu"] * isig2).T)                       # [dim, K]
        gcs.append(0.5 * jnp.sum((p["mu"] * p["inv_sigma"]) ** 2,
                                 axis=-1, keepdims=True).T)   # [1, K]
        # pad fc weight: [fi, K*fo] -> [FP, K*FP], each k-block lane-aligned
        wfc_pad = jnp.zeros((FP, n_kernels * FP), jnp.float32)
        for k in range(n_kernels):
            wfc_pad = wfc_pad.at[:fi, k * FP:k * FP + fo].set(
                p["wfc"][:, k * fo:(k + 1) * fo])
        wfcs.append(wfc_pad.astype(jnp.bfloat16))
        biases.append(jnp.zeros((1, FP), jnp.float32).at[:, :fo].set(p["bias"]))
    stack = lambda xs: jnp.stack(xs, axis=0)
    return tuple(stack(x) for x in (wps, bps, gAs, gBs, gcs, wfcs, biases))


def monet_forward(feat, pseudo, src_onehot, dst_onehot_T,
                  layer_params, layer_dims, n_kernels):
    """Whole MoNet forward pass as a single fused pallas_call."""
    n_nodes = feat.shape[0]
    out_feats = layer_dims[-1][1]
    packed = pack_params(layer_params, layer_dims, n_kernels)
    h0 = jnp.zeros((n_nodes, FP), jnp.float32).at[:, :feat.shape[1]].set(feat)
    src_b = src_onehot.astype(jnp.bfloat16)      # 0/1 exact in bf16
    dstT_b = dst_onehot_T.astype(jnp.bfloat16)

    kernel = functools.partial(
        monet_kernel, n_layers=len(layer_params),
        n_kernels=n_kernels, out_pad=FP)

    vmem = pl.BlockSpec(memory_space=pltpu.MemorySpace.VMEM)
    out_pad = pl.pallas_call(
        kernel,
        out_shape=jax.ShapeDtypeStruct((n_nodes, FP), jnp.float32),
        in_specs=[vmem] * 11,
        out_specs=vmem,
        compiler_params=pltpu.CompilerParams(vmem_limit_bytes=32 * 1024 * 1024),
    )(h0, pseudo, src_b, dstT_b, *packed)
    return out_pad[:, :out_feats]


# ----------------------------- references ----------------------------------- #

def monet_matched_reference(feat, pseudo, src_onehot, dst_onehot_T,
                            layer_params, layer_dims, n_kernels):
    """Pure-JAX reference with the SAME padding / bf16 casts as the kernel."""
    n_nodes = feat.shape[0]
    out_feats = layer_dims[-1][1]
    packed = pack_params(layer_params, layer_dims, n_kernels)
    h0 = jnp.zeros((n_nodes, FP), jnp.float32).at[:, :feat.shape[1]].set(feat)
    out = _monet_layers(h0, pseudo,
                        src_onehot.astype(jnp.bfloat16),
                        dst_onehot_T.astype(jnp.bfloat16),
                        *packed,
                        n_layers=len(layer_params),
                        n_kernels=n_kernels, out_pad=FP)
    return out[:, :out_feats]


def monet_reference_f32(feat, pseudo, src_idx, dst_idx, layer_params):
    """Full-f32 DGL-style reference (explicit gather / scatter-add)."""
    h = feat
    n_nodes = feat.shape[0]
    for p in layer_params:
        n_kernels = p["mu"].shape[0]
        out_feats = p["bias"].shape[-1]
        u = jnp.tanh(pseudo @ p["wp"] + p["bp"])                       # [E, dim]
        diff = u[:, None, :] - p["mu"][None, :, :]                     # [E, K, dim]
        gauss = jnp.exp(-0.5 * jnp.sum((diff * p["inv_sigma"][None]) ** 2, -1))
        fc_h = (h @ p["wfc"]).reshape(n_nodes, n_kernels, out_feats)   # [N, K, out]
        msg = jnp.sum(gauss[:, :, None] * fc_h[src_idx], axis=1)       # [E, out]
        rst = jnp.zeros((n_nodes, out_feats), jnp.float32).at[dst_idx].add(msg)
        h = rst + p["bias"]
    return h


# ------------------------------ init helpers -------------------------------- #

def init_layer_params(key, in_feats, out_feats, dim, n_kernels):
    ks = jax.random.split(key, 6)
    return {
        "wp": jax.random.normal(ks[0], (2, dim), jnp.float32) * 0.5,
        "bp": jax.random.normal(ks[1], (1, dim), jnp.float32) * 0.1,
        "mu": jax.random.normal(ks[2], (n_kernels, dim), jnp.float32) * 0.1,
        "inv_sigma": jnp.ones((n_kernels, dim), jnp.float32),
        "wfc": jax.random.normal(ks[3], (in_feats, n_kernels * out_feats),
                                 jnp.float32) / jnp.sqrt(float(in_feats)),
        "bias": jax.random.normal(ks[4], (1, out_feats), jnp.float32) * 0.01,
    }


# ---------------------------------- main ------------------------------------ #

if __name__ == "__main__":
    key = jax.random.PRNGKey(0)

    # small synthetic graph / sizes (matches MoNet.__init__ layer structure)
    N = 16            # nodes
    in_feats = 8
    n_hidden = 32
    out_feats = 8
    n_layers = 2      # -> 3 GMMConv layers total
    dim = 4
    n_kernels = 3

    # ring graph + self loops -> E = 2N edges
    src_idx = jnp.concatenate([jnp.arange(N), jnp.arange(N)])
    dst_idx = jnp.concatenate([(jnp.arange(N) + 1) % N, jnp.arange(N)])
    E = src_idx.shape[0]

    src_onehot = jax.nn.one_hot(src_idx, N, dtype=jnp.float32)        # [E, N]
    dst_onehot_T = jax.nn.one_hot(dst_idx, N, dtype=jnp.float32).T    # [N, E]

    k_feat, k_pseudo, k_params = jax.random.split(key, 3)
    feat = jax.random.normal(k_feat, (N, in_feats), jnp.float32)
    pseudo = jax.random.normal(k_pseudo, (E, 2), jnp.float32)

    layer_dims = [(in_feats, n_hidden)] + [(n_hidden, n_hidden)] * (n_layers - 1) \
                 + [(n_hidden, out_feats)]
    param_keys = jax.random.split(k_params, len(layer_dims))
    layer_params = [init_layer_params(pk, fi, fo, dim, n_kernels)
                    for pk, (fi, fo) in zip(param_keys, layer_dims)]

    out = monet_forward(feat, pseudo, src_onehot, dst_onehot_T,
                        layer_params, layer_dims, n_kernels)
    out = jax.block_until_ready(out)
    assert out.shape == (N, out_feats)

    # 1) tight check vs a precision-matched (bf16 matmul) pure-JAX reference
    ref_m = monet_matched_reference(feat, pseudo, src_onehot, dst_onehot_T,
                                    layer_params, layer_dims, n_kernels)
    err_m = jnp.max(jnp.abs(out - ref_m))
    assert jnp.allclose(out, ref_m, atol=1e-2, rtol=1e-2), \
        f"kernel vs matched ref: max abs err {err_m}"

    # 2) loose semantic check vs the full-f32 DGL-style reference
    ref_f = monet_reference_f32(feat, pseudo, src_idx, dst_idx, layer_params)
    err_f = jnp.max(jnp.abs(out - ref_f))
    assert jnp.allclose(out, ref_f, atol=1e-1, rtol=1e-1), \
        f"kernel vs f32 ref: max abs err {err_f}"

    print("KERNEL_OK")
</pallas_src>

<mosaic_0001>
module attributes {stable_mosaic.version = 11 : i64} {
  func.func @monet_kernel(%arg0: memref<16x128xf32, #tpu.memory_space<vmem>>, %arg1: memref<32x2xf32, #tpu.memory_space<vmem>>, %arg2: memref<32x16xbf16, #tpu.memory_space<vmem>>, %arg3: memref<16x32xbf16, #tpu.memory_space<vmem>>, %arg4: memref<3x2x4xf32, #tpu.memory_space<vmem>>, %arg5: memref<3x1x4xf32, #tpu.memory_space<vmem>>, %arg6: memref<3x4x3xf32, #tpu.memory_space<vmem>>, %arg7: memref<3x4x3xf32, #tpu.memory_space<vmem>>, %arg8: memref<3x1x3xf32, #tpu.memory_space<vmem>>, %arg9: memref<3x128x384xbf16, #tpu.memory_space<vmem>>, %arg10: memref<3x1x128xf32, #tpu.memory_space<vmem>>, %arg11: memref<16x128xf32, #tpu.memory_space<vmem>>) attributes {dimension_semantics = [], scalar_prefetch = 0 : i64, scratch_operands = 0 : i64, tpu.core_type = #tpu.core_type<tc>} {
    %c0 = arith.constant 0 : index
    %c0_0 = arith.constant 0 : index
    %0 = vector.load %arg0[%c0, %c0_0] : memref<16x128xf32, #tpu.memory_space<vmem>>, vector<16x128xf32>
    %c0_1 = arith.constant 0 : index
    %c0_2 = arith.constant 0 : index
    %1 = vector.load %arg1[%c0_1, %c0_2] : memref<32x2xf32, #tpu.memory_space<vmem>>, vector<32x2xf32>
    %c0_3 = arith.constant 0 : index
    %c0_4 = arith.constant 0 : index
    %2 = vector.load %arg2[%c0_3, %c0_4] : memref<32x16xbf16, #tpu.memory_space<vmem>>, vector<32x16xbf16>
    %c0_5 = arith.constant 0 : index
    %c0_6 = arith.constant 0 : index
    %3 = vector.load %arg3[%c0_5, %c0_6] : memref<16x32xbf16, #tpu.memory_space<vmem>>, vector<16x32xbf16>
    %c0_7 = arith.constant 0 : index
    %c0_8 = arith.constant 0 : index
    %c0_9 = arith.constant 0 : index
    %4 = vector.load %arg4[%c0_7, %c0_8, %c0_9] : memref<3x2x4xf32, #tpu.memory_space<vmem>>, vector<3x2x4xf32>
    %c0_10 = arith.constant 0 : index
    %c0_11 = arith.constant 0 : index
    %c0_12 = arith.constant 0 : index
    %5 = vector.load %arg5[%c0_10, %c0_11, %c0_12] : memref<3x1x4xf32, #tpu.memory_space<vmem>>, vector<3x1x4xf32>
    %c0_13 = arith.constant 0 : index
    %c0_14 = arith.constant 0 : index
    %c0_15 = arith.constant 0 : index
    %6 = vector.load %arg6[%c0_13, %c0_14, %c0_15] : memref<3x4x3xf32, #tpu.memory_space<vmem>>, vector<3x4x3xf32>
    %c0_16 = arith.constant 0 : index
    %c0_17 = arith.constant 0 : index
    %c0_18 = arith.constant 0 : index
    %7 = vector.load %arg7[%c0_16, %c0_17, %c0_18] : memref<3x4x3xf32, #tpu.memory_space<vmem>>, vector<3x4x3xf32>
    %c0_19 = arith.constant 0 : index
    %c0_20 = arith.constant 0 : index
    %c0_21 = arith.constant 0 : index
    %8 = vector.load %arg8[%c0_19, %c0_20, %c0_21] : memref<3x1x3xf32, #tpu.memory_space<vmem>>, vector<3x1x3xf32>
    %c0_22 = arith.constant 0 : index
    %c0_23 = arith.constant 0 : index
    %c0_24 = arith.constant 0 : index
    %9 = vector.load %arg9[%c0_22, %c0_23, %c0_24] : memref<3x128x384xbf16, #tpu.memory_space<vmem>>, vector<3x128x384xbf16>
    %c0_25 = arith.constant 0 : index
    %c0_26 = arith.constant 0 : index
    %c0_27 = arith.constant 0 : index
    %10 = vector.load %arg10[%c0_25, %c0_26, %c0_27] : memref<3x1x128xf32, #tpu.memory_space<vmem>>, vector<3x1x128xf32>
    %11 = vector.extract_strided_slice %4 {offsets = [0, 0, 0], sizes = [1, 2, 4], strides = [1, 1, 1]} : vector<3x2x4xf32> to vector<1x2x4xf32>
    %12 = vector.shape_cast %11 : vector<1x2x4xf32> to vector<2x4xf32>
    %cst = arith.constant dense<0.000000e+00> : vector<32x4xf32>
    %13 = tpu.matmul %1, %12, %cst {dimension_numbers = #tpu.dot_dimension_numbers<[1], [0], [0], [1], [0, 0, 1, 1], [], []>} : vector<32x2xf32>, vector<2x4xf32>, vector<32x4xf32> -> vector<32x4xf32>
    %14 = vector.extract_strided_slice %5 {offsets = [0, 0, 0], sizes = [1, 1, 4], strides = [1, 1, 1]} : vector<3x1x4xf32> to vector<1x1x4xf32>
    %15 = vector.shape_cast %14 : vector<1x1x4xf32> to vector<1x4xf32>
    %16 = vector.broadcast %15 : vector<1x4xf32> to vector<32x4xf32>
    %17 = arith.addf %13, %16 : vector<32x4xf32>
    %18 = math.tanh %17 : vector<32x4xf32>
    %19 = vector.extract_strided_slice %7 {offsets = [0, 0, 0], sizes = [1, 4, 3], strides = [1, 1, 1]} : vector<3x4x3xf32> to vector<1x4x3xf32>
    %20 = vector.shape_cast %19 : vector<1x4x3xf32> to vector<4x3xf32>
    %cst_28 = arith.constant dense<0.000000e+00> : vector<32x3xf32>
    %21 = tpu.matmul %18, %20, %cst_28 {dimension_numbers = #tpu.dot_dimension_numbers<[1], [0], [0], [1], [0, 0, 1, 1], [], []>} : vector<32x4xf32>, vector<4x3xf32>, vector<32x3xf32> -> vector<32x3xf32>
    %22 = arith.mulf %18, %18 : vector<32x4xf32>
    %23 = vector.extract_strided_slice %6 {offsets = [0, 0, 0], sizes = [1, 4, 3], strides = [1, 1, 1]} : vector<3x4x3xf32> to vector<1x4x3xf32>
    %24 = vector.shape_cast %23 : vector<1x4x3xf32> to vector<4x3xf32>
    %cst_29 = arith.constant dense<0.000000e+00> : vector<32x3xf32>
    %25 = tpu.matmul %22, %24, %cst_29 {dimension_numbers = #tpu.dot_dimension_numbers<[1], [0], [0], [1], [0, 0, 1, 1], [], []>} : vector<32x4xf32>, vector<4x3xf32>, vector<32x3xf32> -> vector<32x3xf32>
    %cst_30 = arith.constant 5.000000e-01 : f32
    %26 = vector.broadcast %cst_30 : f32 to vector<32x3xf32>
    %27 = arith.mulf %26, %25 : vector<32x3xf32>
    %28 = arith.subf %21, %27 : vector<32x3xf32>
    %29 = vector.extract_strided_slice %8 {offsets = [0, 0, 0], sizes = [1, 1, 3], strides = [1, 1, 1]} : vector<3x1x3xf32> to vector<1x1x3xf32>
    %30 = vector.shape_cast %29 : vector<1x1x3xf32> to vector<1x3xf32>
    %31 = vector.broadcast %30 : vector<1x3xf32> to vector<32x3xf32>
    %32 = arith.subf %28, %31 : vector<32x3xf32>
    %33 = math.exp %32 : vector<32x3xf32>
    %34 = arith.truncf %0 : vector<16x128xf32> to vector<16x128xbf16>
    %35 = vector.extract_strided_slice %9 {offsets = [0, 0, 0], sizes = [1, 128, 384], strides = [1, 1, 1]} : vector<3x128x384xbf16> to vector<1x128x384xbf16>
    %36 = vector.shape_cast %35 : vector<1x128x384xbf16> to vector<128x384xbf16>
    %cst_31 = arith.constant dense<0.000000e+00> : vector<16x384xf32>
    %37 = tpu.matmul %34, %36, %cst_31 {dimension_numbers = #tpu.dot_dimension_numbers<[1], [0], [0], [1], [0, 0, 1, 1], [], []>} : vector<16x128xbf16>, vector<128x384xbf16>, vector<16x384xf32> -> vector<16x384xf32>
    %38 = arith.truncf %37 : vector<16x384xf32> to vector<16x384xbf16>
    %cst_32 = arith.constant dense<0.000000e+00> : vector<32x384xf32>
    %39 = tpu.matmul %2, %38, %cst_32 {dimension_numbers = #tpu.dot_dimension_numbers<[1], [0], [0], [1], [0, 0, 1, 1], [], []>} : vector<32x16xbf16>, vector<16x384xbf16>, vector<32x384xf32> -> vector<32x384xf32>
    %cst_33 = arith.constant 0.000000e+00 : f32
    %40 = vector.broadcast %cst_33 : f32 to vector<32x128xf32>
    %41 = vector.extract_strided_slice %33 {offsets = [0, 0], sizes = [32, 1], strides = [1, 1]} : vector<32x3xf32> to vector<32x1xf32>
    %42 = vector.extract_strided_slice %39 {offsets = [0, 0], sizes = [32, 128], strides = [1, 1]} : vector<32x384xf32> to vector<32x128xf32>
    %43 = vector.broadcast %41 : vector<32x1xf32> to vector<32x128xf32>
    %44 = arith.mulf %43, %42 : vector<32x128xf32>
    %45 = arith.addf %40, %44 : vector<32x128xf32>
    %46 = vector.extract_strided_slice %33 {offsets = [0, 1], sizes = [32, 1], strides = [1, 1]} : vector<32x3xf32> to vector<32x1xf32>
    %47 = vector.extract_strided_slice %39 {offsets = [0, 128], sizes = [32, 128], strides = [1, 1]} : vector<32x384xf32> to vector<32x128xf32>
    %48 = vector.broadcast %46 : vector<32x1xf32> to vector<32x128xf32>
    %49 = arith.mulf %48, %47 : vector<32x128xf32>
    %50 = arith.addf %45, %49 : vector<32x128xf32>
    %51 = vector.extract_strided_slice %33 {offsets = [0, 2], sizes = [32, 1], strides = [1, 1]} : vector<32x3xf32> to vector<32x1xf32>
    %52 = vector.extract_strided_slice %39 {offsets = [0, 256], sizes = [32, 128], strides = [1, 1]} : vector<32x384xf32> to vector<32x128xf32>
    %53 = vector.broadcast %51 : vector<32x1xf32> to vector<32x128xf32>
    %54 = arith.mulf %53, %52 : vector<32x128xf32>
    %55 = arith.addf %50, %54 : vector<32x128xf32>
    %56 = arith.truncf %55 : vector<32x128xf32> to vector<32x128xbf16>
    %cst_34 = arith.constant dense<0.000000e+00> : vector<16x128xf32>
    %57 = tpu.matmul %3, %56, %cst_34 {dimension_numbers = #tpu.dot_dimension_numbers<[1], [0], [0], [1], [0, 0, 1, 1], [], []>} : vector<16x32xbf16>, vector<32x128xbf16>, vector<16x128xf32> -> vector<16x128xf32>
    %58 = vector.extract_strided_slice %10 {offsets = [0, 0, 0], sizes = [1, 1, 128], strides = [1, 1, 1]} : vector<3x1x128xf32> to vector<1x1x128xf32>
    %59 = vector.shape_cast %58 : vector<1x1x128xf32> to vector<1x128xf32>
    %60 = vector.broadcast %59 : vector<1x128xf32> to vector<16x128xf32>
    %61 = arith.addf %57, %60 : vector<16x128xf32>
    %62 = vector.extract_strided_slice %4 {offsets = [1, 0, 0], sizes = [1, 2, 4], strides = [1, 1, 1]} : vector<3x2x4xf32> to vector<1x2x4xf32>
    %63 = vector.shape_cast %62 : vector<1x2x4xf32> to vector<2x4xf32>
    %cst_35 = arith.constant dense<0.000000e+00> : vector<32x4xf32>
    %64 = tpu.matmul %1, %63, %cst_35 {dimension_numbers = #tpu.dot_dimension_numbers<[1], [0], [0], [1], [0, 0, 1, 1], [], []>} : vector<32x2xf32>, vector<2x4xf32>, vector<32x4xf32> -> vector<32x4xf32>
    %65 = vector.extract_strided_slice %5 {offsets = [1, 0, 0], sizes = [1, 1, 4], strides = [1, 1, 1]} : vector<3x1x4xf32> to vector<1x1x4xf32>
    %66 = vector.shape_cast %65 : vector<1x1x4xf32> to vector<1x4xf32>
    %67 = vector.broadcast %66 : vector<1x4xf32> to vector<32x4xf32>
    %68 = arith.addf %64, %67 : vector<32x4xf32>
    %69 = math.tanh %68 : vector<32x4xf32>
    %70 = vector.extract_strided_slice %7 {offsets = [1, 0, 0], sizes = [1, 4, 3], strides = [1, 1, 1]} : vector<3x4x3xf32> to vector<1x4x3xf32>
    %71 = vector.shape_cast %70 : vector<1x4x3xf32> to vector<4x3xf32>
    %cst_36 = arith.constant dense<0.000000e+00> : vector<32x3xf32>
    %72 = tpu.matmul %69, %71, %cst_36 {dimension_numbers = #tpu.dot_dimension_numbers<[1], [0], [0], [1], [0, 0, 1, 1], [], []>} : vector<32x4xf32>, vector<4x3xf32>, vector<32x3xf32> -> vector<32x3xf32>
    %73 = arith.mulf %69, %69 : vector<32x4xf32>
    %74 = vector.extract_strided_slice %6 {offsets = [1, 0, 0], sizes = [1, 4, 3], strides = [1, 1, 1]} : vector<3x4x3xf32> to vector<1x4x3xf32>
    %75 = vector.shape_cast %74 : vector<1x4x3xf32> to vector<4x3xf32>
    %cst_37 = arith.constant dense<0.000000e+00> : vector<32x3xf32>
    %76 = tpu.matmul %73, %75, %cst_37 {dimension_numbers = #tpu.dot_dimension_numbers<[1], [0], [0], [1], [0, 0, 1, 1], [], []>} : vector<32x4xf32>, vector<4x3xf32>, vector<32x3xf32> -> vector<32x3xf32>
    %cst_38 = arith.constant 5.000000e-01 : f32
    %77 = vector.broadcast %cst_38 : f32 to vector<32x3xf32>
    %78 = arith.mulf %77, %76 : vector<32x3xf32>
    %79 = arith.subf %72, %78 : vector<32x3xf32>
    %80 = vector.extract_strided_slice %8 {offsets = [1, 0, 0], sizes = [1, 1, 3], strides = [1, 1, 1]} : vector<3x1x3xf32> to vector<1x1x3xf32>
    %81 = vector.shape_cast %80 : vector<1x1x3xf32> to vector<1x3xf32>
    %82 = vector.broadcast %81 : vector<1x3xf32> to vector<32x3xf32>
    %83 = arith.subf %79, %82 : vector<32x3xf32>
    %84 = math.exp %83 : vector<32x3xf32>
    %85 = arith.truncf %61 : vector<16x128xf32> to vector<16x128xbf16>
    %86 = vector.extract_strided_slice %9 {offsets = [1, 0, 0], sizes = [1, 128, 384], strides = [1, 1, 1]} : vector<3x128x384xbf16> to vector<1x128x384xbf16>
    %87 = vector.shape_cast %86 : vector<1x128x384xbf16> to vector<128x384xbf16>
    %cst_39 = arith.constant dense<0.000000e+00> : vector<16x384xf32>
    %88 = tpu.matmul %85, %87, %cst_39 {dimension_numbers = #tpu.dot_dimension_numbers<[1], [0], [0], [1], [0, 0, 1, 1], [], []>} : vector<16x128xbf16>, vector<128x384xbf16>, vector<16x384xf32> -> vector<16x384xf32>
    %89 = arith.truncf %88 : vector<16x384xf32> to vector<16x384xbf16>
    %cst_40 = arith.constant dense<0.000000e+00> : vector<32x384xf32>
    %90 = tpu.matmul %2, %89, %cst_40 {dimension_numbers = #tpu.dot_dimension_numbers<[1], [0], [0], [1], [0, 0, 1, 1], [], []>} : vector<32x16xbf16>, vector<16x384xbf16>, vector<32x384xf32> -> vector<32x384xf32>
    %cst_41 = arith.constant 0.000000e+00 : f32
    %91 = vector.broadcast %cst_41 : f32 to vector<32x128xf32>
    %92 = vector.extract_strided_slice %84 {offsets = [0, 0], sizes = [32, 1], strides = [1, 1]} : vector<32x3xf32> to vector<32x1xf32>
    %93 = vector.extract_strided_slice %90 {offsets = [0, 0], sizes = [32, 128], strides = [1, 1]} : vector<32x384xf32> to vector<32x128xf32>
    %94 = vector.broadcast %92 : vector<32x1xf32> to vector<32x128xf32>
    %95 = arith.mulf %94, %93 : vector<32x128xf32>
    %96 = arith.addf %91, %95 : vector<32x128xf32>
    %97 = vector.extract_strided_slice %84 {offsets = [0, 1], sizes = [32, 1], strides = [1, 1]} : vector<32x3xf32> to vector<32x1xf32>
    %98 = vector.extract_strided_slice %90 {offsets = [0, 128], sizes = [32, 128], strides = [1, 1]} : vector<32x384xf32> to vector<32x128xf32>
    %99 = vector.broadcast %97 : vector<32x1xf32> to vector<32x128xf32>
    %100 = arith.mulf %99, %98 : vector<32x128xf32>
    %101 = arith.addf %96, %100 : vector<32x128xf32>
    %102 = vector.extract_strided_slice %84 {offsets = [0, 2], sizes = [32, 1], strides = [1, 1]} : vector<32x3xf32> to vector<32x1xf32>
    %103 = vector.extract_strided_slice %90 {offsets = [0, 256], sizes = [32, 128], strides = [1, 1]} : vector<32x384xf32> to vector<32x128xf32>
    %104 = vector.broadcast %102 : vector<32x1xf32> to vector<32x128xf32>
    %105 = arith.mulf %104, %103 : vector<32x128xf32>
    %106 = arith.addf %101, %105 : vector<32x128xf32>
    %107 = arith.truncf %106 : vector<32x128xf32> to vector<32x128xbf16>
    %cst_42 = arith.constant dense<0.000000e+00> : vector<16x128xf32>
    %108 = tpu.matmul %3, %107, %cst_42 {dimension_numbers = #tpu.dot_dimension_numbers<[1], [0], [0], [1], [0, 0, 1, 1], [], []>} : vector<16x32xbf16>, vector<32x128xbf16>, vector<16x128xf32> -> vector<16x128xf32>
    %109 = vector.extract_strided_slice %10 {offsets = [1, 0, 0], sizes = [1, 1, 128], strides = [1, 1, 1]} : vector<3x1x128xf32> to vector<1x1x128xf32>
    %110 = vector.shape_cast %109 : vector<1x1x128xf32> to vector<1x128xf32>
    %111 = vector.broadcast %110 : vector<1x128xf32> to vector<16x128xf32>
    %112 = arith.addf %108, %111 : vector<16x128xf32>
    %113 = vector.extract_strided_slice %4 {offsets = [2, 0, 0], sizes = [1, 2, 4], strides = [1, 1, 1]} : vector<3x2x4xf32> to vector<1x2x4xf32>
    %114 = vector.shape_cast %113 : vector<1x2x4xf32> to vector<2x4xf32>
    %cst_43 = arith.constant dense<0.000000e+00> : vector<32x4xf32>
    %115 = tpu.matmul %1, %114, %cst_43 {dimension_numbers = #tpu.dot_dimension_numbers<[1], [0], [0], [1], [0, 0, 1, 1], [], []>} : vector<32x2xf32>, vector<2x4xf32>, vector<32x4xf32> -> vector<32x4xf32>
    %116 = vector.extract_strided_slice %5 {offsets = [2, 0, 0], sizes = [1, 1, 4], strides = [1, 1, 1]} : vector<3x1x4xf32> to vector<1x1x4xf32>
    %117 = vector.shape_cast %116 : vector<1x1x4xf32> to vector<1x4xf32>
    %118 = vector.broadcast %117 : vector<1x4xf32> to vector<32x4xf32>
    %119 = arith.addf %115, %118 : vector<32x4xf32>
    %120 = math.tanh %119 : vector<32x4xf32>
    %121 = vector.extract_strided_slice %7 {offsets = [2, 0, 0], sizes = [1, 4, 3], strides = [1, 1, 1]} : vector<3x4x3xf32> to vector<1x4x3xf32>
    %122 = vector.shape_cast %121 : vector<1x4x3xf32> to vector<4x3xf32>
    %cst_44 = arith.constant dense<0.000000e+00> : vector<32x3xf32>
    %123 = tpu.matmul %120, %122, %cst_44 {dimension_numbers = #tpu.dot_dimension_numbers<[1], [0], [0], [1], [0, 0, 1, 1], [], []>} : vector<32x4xf32>, vector<4x3xf32>, vector<32x3xf32> -> vector<32x3xf32>
    %124 = arith.mulf %120, %120 : vector<32x4xf32>
    %125 = vector.extract_strided_slice %6 {offsets = [2, 0, 0], sizes = [1, 4, 3], strides = [1, 1, 1]} : vector<3x4x3xf32> to vector<1x4x3xf32>
    %126 = vector.shape_cast %125 : vector<1x4x3xf32> to vector<4x3xf32>
    %cst_45 = arith.constant dense<0.000000e+00> : vector<32x3xf32>
    %127 = tpu.matmul %124, %126, %cst_45 {dimension_numbers = #tpu.dot_dimension_numbers<[1], [0], [0], [1], [0, 0, 1, 1], [], []>} : vector<32x4xf32>, vector<4x3xf32>, vector<32x3xf32> -> vector<32x3xf32>
    %cst_46 = arith.constant 5.000000e-01 : f32
    %128 = vector.broadcast %cst_46 : f32 to vector<32x3xf32>
    %129 = arith.mulf %128, %127 : vector<32x3xf32>
    %130 = arith.subf %123, %129 : vector<32x3xf32>
    %131 = vector.extract_strided_slice %8 {offsets = [2, 0, 0], sizes = [1, 1, 3], strides = [1, 1, 1]} : vector<3x1x3xf32> to vector<1x1x3xf32>
    %132 = vector.shape_cast %131 : vector<1x1x3xf32> to vector<1x3xf32>
    %133 = vector.broadcast %132 : vector<1x3xf32> to vector<32x3xf32>
    %134 = arith.subf %130, %133 : vector<32x3xf32>
    %135 = math.exp %134 : vector<32x3xf32>
    %136 = arith.truncf %112 : vector<16x128xf32> to vector<16x128xbf16>
    %137 = vector.extract_strided_slice %9 {offsets = [2, 0, 0], sizes = [1, 128, 384], strides = [1, 1, 1]} : vector<3x128x384xbf16> to vector<1x128x384xbf16>
    %138 = vector.shape_cast %137 : vector<1x128x384xbf16> to vector<128x384xbf16>
    %cst_47 = arith.constant dense<0.000000e+00> : vector<16x384xf32>
    %139 = tpu.matmul %136, %138, %cst_47 {dimension_numbers = #tpu.dot_dimension_numbers<[1], [0], [0], [1], [0, 0, 1, 1], [], []>} : vector<16x128xbf16>, vector<128x384xbf16>, vector<16x384xf32> -> vector<16x384xf32>
    %140 = arith.truncf %139 : vector<16x384xf32> to vector<16x384xbf16>
    %cst_48 = arith.constant dense<0.000000e+00> : vector<32x384xf32>
    %141 = tpu.matmul %2, %140, %cst_48 {dimension_numbers = #tpu.dot_dimension_numbers<[1], [0], [0], [1], [0, 0, 1, 1], [], []>} : vector<32x16xbf16>, vector<16x384xbf16>, vector<32x384xf32> -> vector<32x384xf32>
    %cst_49 = arith.constant 0.000000e+00 : f32
    %142 = vector.broadcast %cst_49 : f32 to vector<32x128xf32>
    %143 = vector.extract_strided_slice %135 {offsets = [0, 0], sizes = [32, 1], strides = [1, 1]} : vector<32x3xf32> to vector<32x1xf32>
    %144 = vector.extract_strided_slice %141 {offsets = [0, 0], sizes = [32, 128], strides = [1, 1]} : vector<32x384xf32> to vector<32x128xf32>
    %145 = vector.broadcast %143 : vector<32x1xf32> to vector<32x128xf32>
    %146 = arith.mulf %145, %144 : vector<32x128xf32>
    %147 = arith.addf %142, %146 : vector<32x128xf32>
    %148 = vector.extract_strided_slice %135 {offsets = [0, 1], sizes = [32, 1], strides = [1, 1]} : vector<32x3xf32> to vector<32x1xf32>
    %149 = vector.extract_strided_slice %141 {offsets = [0, 128], sizes = [32, 128], strides = [1, 1]} : vector<32x384xf32> to vector<32x128xf32>
    %150 = vector.broadcast %148 : vector<32x1xf32> to vector<32x128xf32>
    %151 = arith.mulf %150, %149 : vector<32x128xf32>
    %152 = arith.addf %147, %151 : vector<32x128xf32>
    %153 = vector.extract_strided_slice %135 {offsets = [0, 2], sizes = [32, 1], strides = [1, 1]} : vector<32x3xf32> to vector<32x1xf32>
    %154 = vector.extract_strided_slice %141 {offsets = [0, 256], sizes = [32, 128], strides = [1, 1]} : vector<32x384xf32> to vector<32x128xf32>
    %155 = vector.broadcast %153 : vector<32x1xf32> to vector<32x128xf32>
    %156 = arith.mulf %155, %154 : vector<32x128xf32>
    %157 = arith.addf %152, %156 : vector<32x128xf32>
    %158 = arith.truncf %157 : vector<32x128xf32> to vector<32x128xbf16>
    %cst_50 = arith.constant dense<0.000000e+00> : vector<16x128xf32>
    %159 = tpu.matmul %3, %158, %cst_50 {dimension_numbers = #tpu.dot_dimension_numbers<[1], [0], [0], [1], [0, 0, 1, 1], [], []>} : vector<16x32xbf16>, vector<32x128xbf16>, vector<16x128xf32> -> vector<16x128xf32>
    %160 = vector.extract_strided_slice %10 {offsets = [2, 0, 0], sizes = [1, 1, 128], strides = [1, 1, 1]} : vector<3x1x128xf32> to vector<1x1x128xf32>
    %161 = vector.shape_cast %160 : vector<1x1x128xf32> to vector<1x128xf32>
    %162 = vector.broadcast %161 : vector<1x128xf32> to vector<16x128xf32>
    %163 = arith.addf %159, %162 : vector<16x128xf32>
    %c0_51 = arith.constant 0 : index
    %c0_52 = arith.constant 0 : index
    %164 = vector.load %arg11[%c0_51, %c0_52] : memref<16x128xf32, #tpu.memory_space<vmem>>, vector<16x128xf32>
    tpu.vector_store %arg11[%c0_51, %c0_52], %163 {strides = array<i32>} : memref<16x128xf32, #tpu.memory_space<vmem>>, vector<16x128xf32>,
    return
  }
}

</mosaic_0001>

<bundles_post_ra>
// kernel: tpu_custom_call.1
= control target key start
LH: loop header
LB: loop body
LE: loop exit
PB: predicated region body
PF: predicated region fallthrough
CT: control target
= control target key end

     0   :  { %16 = vsyncpa [#allocation3], 0  ;;  %s2590_s0 = inlined_call_operand.vmem [shape: f32[16,128], index: 0, kind: input, shape index: {}]   ;;  %s2591_s1 = inlined_call_operand.vmem [shape: f32[32,2], index: 1, kind: input, shape index: {}]   ;;  %s2592_s2 = inlined_call_operand.vmem [shape: bf16[32,16], index: 2, kind: input, shape index: {}]   ;;  %s2593_s3 = inlined_call_operand.vmem [shape: bf16[16,32], index: 3, kind: input, shape index: {}]   ;;  %s2594_s4 = inlined_call_operand.vmem [shape: f32[3,2,4], index: 4, kind: input, shape index: {}]   ;;  %s2595_s5 = inlined_call_operand.vmem [shape: f32[3,1,4], index: 5, kind: input, shape index: {}]   ;;  %s2596_s6 = inlined_call_operand.vmem [shape: f32[3,4,3], index: 6, kind: input, shape index: {}]   ;;  %s2597_s7 = inlined_call_operand.vmem [shape: f32[3,4,3], index: 7, kind: input, shape index: {}]   ;;  %s2598_s8 = inlined_call_operand.vmem [shape: f32[3,1,3], index: 8, kind: input, shape index: {}]   ;;  %s2599_s9 = inlined_call_operand.hbm [shape: bf16[3,128,384], index: 9, kind: input, shape index: {}]   ;;  %s2600_s10 = inlined_call_operand.vmem [shape: f32[3,1,128], index: 10, kind: input, shape index: {}]   ;;  %s2601_s11 = inlined_call_operand.hbm [shape: f32[16,128], index: 11, kind: output, shape index: {}]  }
   0x1   :  { %17 = vsyncpa [#allocation4], 0  ;;  %s40_s19 = sshll.u32 %s2599_s9, 4  ;;  %s2273_s20 = smov [#allocation2]   ;;  %s41_s19 = int_to_ptr.hbm [resolvable:$true] %s40_s19 }
   0x2   :  { %s42_s21 = sshll.u32 %s2273_s20, 4  ;;  %s2274_s22 = smov 192   ;;  %s43_s21 = int_to_ptr.vmem [resolvable:$true] %s42_s21 }
   0x3   :  { %s2275_s23 = smov 12  }
   0x4   :  { %48 = dma.hbm_to_vmem [thread:$0]  %s41_s19, 9216, %s43_s21, [#allocation3], %s2274_s22, %s2274_s22, %s2275_s23  }
   0x5   :  { %2269 = dma.done.wait [#allocation3], 9216  }
   0x6   :  { %2270 = vsyncadd [#allocation3], 4294958080  ;;  %vm198_vm0 = vcmask 1041408   ;;  %vm185_vm1 = vcmask 15360   ;;  %v68_v0 = vld [vmem:[%s2594_s4] sm:$0x3] }
   0x7   :  { %v2351_v1 = vld [vmem:[%s2591_s1] sm:$0xff]  ;;  %1685 = vmatpush.msk.msra.mxu0 %vm198_vm0, %v68_v0  ;;  %v2075_v2 = vld [vmem:[#allocation2 + $0xac] sm:$0xf]  ;;  %v1788_v3 = vld [vmem:[#allocation2 + $0xb4] sm:$0xf0]  ;;  %vm248_vm2 = vcmask 1043456  }
   0x8   :  { %1686 = vmatmul.msk.f32.vlgmr.msra.gmra.mxu0 %vm185_vm1, %v2351_v1  ;;  %v2072_v4 = vld [vmem:[#allocation2 + $0x94] sm:$0xf]  ;;  %v1776_v5 = vld [vmem:[#allocation2 + $0x9c] sm:$0xf0]  ;;  %v1791_v6 = vor.u32 %v2075_v2, %v1788_v3  ;;  %v2069_v8 = vld [vmem:[#allocation2 + $0x7c] sm:$0xf] }
   0x9   :  { %v1779_v7 = vor.u32 %v2072_v4, %v1776_v5  ;;  %v1786_v9 = vld [vmem:[#allocation2 + $0xa8] sm:$0xf]  ;;  %v2076_v10 = vld [vmem:[#allocation2 + $0xb0] sm:$0xf0]  ;;  %v1774_v13 = vld [vmem:[#allocation2 + $0x90] sm:$0xf] }
   0xa   :  { %495 = vmatpush.bf16.msrb.mxu0 %v1791_v6  ;;  %v1764_v11 = vld [vmem:[#allocation2 + $0x84] sm:$0xf0]  ;;  %v1787_v12 = vor.u32 %v2076_v10, %v1786_v9  ;;  %v2073_v14 = vld [vmem:[#allocation2 + $0x98] sm:$0xf0]  ;;  %v1762_v18 = vld [vmem:[#allocation2 + $0x78] sm:$0xf] }
   0xb   :  { %v2359_v15 = vld [vmem:[%s2591_s1 + $0x8] sm:$0xff]  ;;  %v1775_v16 = vor.u32 %v2073_v14, %v1774_v13  ;;  %v1767_v17 = vor.u32 %v2069_v8, %v1764_v11  ;;  %v2070_v19 = vld [vmem:[#allocation2 + $0x80] sm:$0xf0]  ;;  %v1752_v21 = vld [vmem:[#allocation2 + $0x6c] sm:$0xf0]  ;;  %vm235_vm3 = vcmask 31744  }
   0xc   :  { %481 = vmatpush.bf16.msra.mxu3 %v1787_v12  ;;  %v2066_v20 = vld [vmem:[#allocation2 + $0x64] sm:$0xf]  ;;  %v2063_v22 = vld [vmem:[#allocation2 + $0x4c] sm:$0xf]  ;;  %v1740_v23 = vld [vmem:[#allocation2 + $0x54] sm:$0xf0]  ;;  %v1763_v24 = vor.u32 %v2070_v19, %v1762_v18 }
   0xd   :  { %v1750_v25 = vld [vmem:[#allocation2 + $0x60] sm:$0xf]  ;;  %v2366_v26 = vld [vmem:[%s2591_s1 + $0x10] sm:$0xff]  ;;  %v1755_v27 = vor.u32 %v2066_v20, %v1752_v21  ;;  %v2067_v28 = vld [vmem:[#allocation2 + $0x68] sm:$0xf0]  ;;  %v1743_v30 = vor.u32 %v2063_v22, %v1740_v23  ;;  %vm536_vm4 = vcmask 130048  }
   0xe   :  { %496 = vmatpush.bf16.msrb.mxu0 %v1779_v7  ;;  %v1751_v29 = vor.u32 %v2067_v28, %v1750_v25  ;;  %v1738_v31 = vld [vmem:[#allocation2 + $0x48] sm:$0xf]  ;;  %v2064_v32 = vld [vmem:[#allocation2 + $0x50] sm:$0xf0]  ;;  %v1728_v34 = vld [vmem:[#allocation2 + $0x3c] sm:$0xf0] }
   0xf   :  { %v2060_v33 = vld [vmem:[#allocation2 + $0x34] sm:$0xf]  ;;  %v1739_v35 = vor.u32 %v2064_v32, %v1738_v31  ;;  %v1726_v37 = vld [vmem:[#allocation2 + $0x30] sm:$0xf]  ;;  %v2061_v38 = vld [vmem:[#allocation2 + $0x38] sm:$0xf0] }
  0x10   :  { %1687 = vmatmul.msk.f32.gmra.mxu0 %vm185_vm1, %v2359_v15  ;;  %482 = vmatpush.bf16.msra.mxu3 %v1775_v16  ;;  %v1731_v36 = vor.u32 %v2060_v33, %v1728_v34  ;;  %v2057_v39 = vld [vmem:[#allocation2 + $0x1c] sm:$0xf]  ;;  %v1716_v40 = vld [vmem:[#allocation2 + $0x24] sm:$0xf0]  ;;  %v1727_v42 = vor.u32 %v2061_v38, %v1726_v37  ;;  %v1714_v44 = vld [vmem:[#allocation2 + $0x18] sm:$0xf] }
  0x11   :  { %v2373_v41 = vld [vmem:[%s2591_s1 + $0x18] sm:$0xff]  ;;  %v1719_v43 = vor.u32 %v2057_v39, %v1716_v40  ;;  %v2058_v45 = vld [vmem:[#allocation2 + $0x20] sm:$0xf0]  ;;  %v1704_v47 = vld [vmem:[#allocation2 + $0xc] sm:$0xf0]  ;;  %vm686_vm5 = vcmask 261120  }
  0x12   :  { %497 = vmatpush.bf16.msrb.mxu0 %v1767_v17  ;;  %v2054_v46 = vld [vmem:[#allocation2 + $0x4] sm:$0xf]  ;;  %v1715_v49 = vor.u32 %v2058_v45, %v1714_v44  ;;  %v57_v51 = vld [vmem:[%s2590_s0 + $0x8] sm:$0xff]  ;;  %v1702_v52 = vld [vmem:[#allocation2] sm:$0xf]  ;;  %s2279_s14 = smov [#allocation5]  }
  0x13   :  { %v56_v48 = vld [vmem:[%s2590_s0] sm:$0xff]  ;;  %v1707_v50 = vor.u32 %v2054_v46, %v1704_v47  ;;  %v2055_v53 = vld [vmem:[#allocation2 + $0x8] sm:$0xf0]  ;;  %v1794_v57 = vld [vmem:[#allocation2 + $0xb0] sm:$0xf]  ;;  %v2276_v47 = vmov 1  }
  0x14   :  { %483 = vmatpush.bf16.msra.mxu3 %v1763_v24  ;;  %v2383_v54 = vpack.c.bf16 %v57_v51, %v56_v48  ;;  %v1703_v55 = vor.u32 %v2055_v53, %v1702_v52  ;;  %v77_v56 = vld [vmem:[%s2597_s7] sm:$0xf]  ;;  %v2077_v58 = vld [vmem:[#allocation2 + $0xb8] sm:$0xf0]  ;;  %v1782_v61 = vld [vmem:[#allocation2 + $0x98] sm:$0xf]  ;;  %2136 = vset.pattern.permute.xlu2 %v2276_v47 }
  0x15   :  { %1690 = vmatpush.msk.msra.mxu1 %vm248_vm2, %v77_v56  ;;  %v74_v59 = vld [vmem:[%s2596_s6] sm:$0xf]  ;;  %v1795_v60 = vor.u32 %v2077_v58, %v1794_v57  ;;  %v2074_v62 = vld [vmem:[#allocation2 + $0xa0] sm:$0xf0]  ;;  %v2071_v2 = vld [vmem:[#allocation2 + $0x88] sm:$0xf0] }
  0x16   :  { %498 = vmatpush.bf16.msrb.mxu0 %v1755_v27  ;;  %1695 = vmatpush.msk.msra.mxu2 %vm248_vm2, %v74_v59  ;;  %v1783_v63 = vor.u32 %v2074_v62, %v1782_v61  ;;  %v1770_v0 = vld [vmem:[#allocation2 + $0x80] sm:$0xf]  ;;  %v1758_v4 = vld [vmem:[#allocation2 + $0x68] sm:$0xf]  ;;  %v2068_v5 = vld [vmem:[#allocation2 + $0x70] sm:$0xf0] }
  0x17   :  { %509 = vmatpush.bf16.msrb.mxu1 %v1795_v60  ;;  %v1771_v3 = vor.u32 %v2071_v2, %v1770_v0  ;;  %v1759_v6 = vor.u32 %v2068_v5, %v1758_v4  ;;  %v1746_v7 = vld [vmem:[#allocation2 + $0x50] sm:$0xf]  ;;  %v2065_v8 = vld [vmem:[#allocation2 + $0x58] sm:$0xf0]  ;;  %v1734_v10 = vld [vmem:[#allocation2 + $0x38] sm:$0xf] }
  0x18   :  { %1688 = vmatmul.msk.f32.gmra.mxu0 %vm185_vm1, %v2366_v26  ;;  %484 = vmatpush.bf16.msra.mxu3 %v1751_v29  ;;  %v1747_v9 = vor.u32 %v2065_v8, %v1746_v7  ;;  %v2062_v11 = vld [vmem:[#allocation2 + $0x40] sm:$0xf0]  ;;  %v2161_v12 = vld [vmem:[%s2595_s5] ss:$0 sm:$0xff]  ;;  %v2059_v17 = vld [vmem:[#allocation2 + $0x28] sm:$0xf0] }
  0x19   :  { %v1735_v13 = vor.u32 %v2062_v11, %v1734_v10  ;;  %v1722_v16 = vld [vmem:[#allocation2 + $0x20] sm:$0xf]  ;;  %v1710_v20 = vld [vmem:[#allocation2 + $0x8] sm:$0xf]  ;;  %v2056_v21 = vld [vmem:[#allocation2 + $0x10] sm:$0xf0] }
  0x1a   :  { %499 = vmatpush.bf16.msrb.mxu0 %v1743_v30  ;;  %v1723_v19 = vor.u32 %v2059_v17, %v1722_v16  ;;  %v1711_v22 = vor.u32 %v2056_v21, %v1710_v20  ;;  %v2419_v46 = vld [vmem:[%s2592_s2 + $0x8] sm:$0xff]  ;;  %v2277_v48 = vmov 0   ;;  %v2162_v53 = vld [vmem:[%s2598_s8] ss:$0 sm:$0xff]  ;;  %v2278_v10 = vmov 2   ;;  %s1670_s15 = sshll.u32 %s2279_s14, 4  ;;  %s1671_s15 = int_to_ptr.vmem [resolvable:$true] %s1670_s15 }
  0x1b   :  { %510 = vmatpush.bf16.msrb.mxu1 %v1783_v63  ;;  %2135 = vset.pattern.permute.xlu0 %v2277_v48  ;;  %s1672_s17 = sshll.u32 %s2601_s11, 4  ;;  %s2281_s18 = smov 8   ;;  %s1673_s17 = int_to_ptr.hbm [resolvable:$true] %s1672_s17 }
  0x1c   :  { %485 = vmatpush.bf16.msra.mxu3 %v1739_v35  ;;  %2137 = vset.pattern.permute.xlu1 %v2277_v48 }
  0x1e   :  { %500 = vmatpush.bf16.msrb.mxu0 %v1731_v36 }
  0x1f   :  { %511 = vmatpush.bf16.msrb.mxu1 %v1771_v3 }
  0x20   :  { %1689 = vmatmul.msk.f32.gmra.mxu0 %vm185_vm1, %v2373_v41  ;;  %486 = vmatpush.bf16.msra.mxu3 %v1727_v42  ;;  %v2410_v42 = vld [vmem:[%s2592_s2] sm:$0xff] }
  0x22   :  { %501 = vmatpush.bf16.msrb.mxu0 %v1719_v43 }
  0x23   :  { %512 = vmatpush.bf16.msrb.mxu1 %v1759_v6 }
  0x24   :  { %487 = vmatpush.bf16.msra.mxu3 %v1715_v49 }
  0x26   :  { %502 = vmatpush.bf16.msrb.mxu0 %v1707_v50 }
  0x27   :  { %513 = vmatpush.bf16.msrb.mxu1 %v1747_v9 }
  0x28   :  { %488 = vmatpush.bf16.msra.mxu3 %v1703_v55 }
  0x29   :  { %503 = vmatmul.bf16.vlgmr.msrb.gmra.mxu0 %v2383_v54 }
  0x2b   :  { %489 = vmatmul.bf16.vlgmr.msra.gmra.mxu3 %v2383_v54  ;;  %514 = vmatpush.bf16.msrb.mxu1 %v1735_v13 }
  0x2f   :  { %515 = vmatpush.bf16.msrb.mxu1 %v1723_v19 }
  0x33   :  { %516 = vmatpush.bf16.msrb.mxu1 %v1711_v22 }
  0x85   :  { %v219_v14 = vpop.f32.mrf.mxu0 }
  0x86   :  { %v220_v18 = vadd.f32 %v2161_v12, %v219_v14 }
  0x88   :  { %2170 = vtanh.f32 %v220_v18 }
  0x8d   :  { %v222_v23 = vpop.f32.mrf.mxu0 }
  0x8e   :  { %v2171_v24 = vpop.eup %2170  ;;  %v223_v25 = vadd.f32 %v2161_v12, %v222_v23 }
  0x8f   :  { %1691 = vmatmul.msk.f32.vlgmr.msra.gmra.mxu1 %vm235_vm3, %v2171_v24  ;;  %v281_v27 = vmul.f32 %v2171_v24, %v2171_v24 }
  0x90   :  { %2172 = vtanh.f32 %v223_v25 }
  0x91   :  { %1696 = vmatmul.msk.f32.vlgmr.msra.gmra.mxu2 %vm235_vm3, %v281_v27 }
  0x95   :  { %v225_v28 = vpop.f32.mrf.mxu0 }
  0x96   :  { %v2173_v29 = vpop.eup %2172  ;;  %v226_v30 = vadd.f32 %v2161_v12, %v225_v28 }
  0x97   :  { %1692 = vmatmul.msk.f32.gmra.mxu1 %vm235_vm3, %v2173_v29  ;;  %v282_v31 = vmul.f32 %v2173_v29, %v2173_v29 }
  0x98   :  { %2174 = vtanh.f32 %v226_v30 }
  0x99   :  { %1697 = vmatmul.msk.f32.gmra.mxu2 %vm235_vm3, %v282_v31 }
  0x9d   :  { %v228_v32 = vpop.f32.mrf.mxu0 }
  0x9e   :  { %v2175_v33 = vpop.eup %2174  ;;  %v229_v34 = vadd.f32 %v2161_v12, %v228_v32 }
  0x9f   :  { %1693 = vmatmul.msk.f32.gmra.mxu1 %vm235_vm3, %v2175_v33  ;;  %v283_v35 = vmul.f32 %v2175_v33, %v2175_v33 }
  0xa0   :  { %2176 = vtanh.f32 %v229_v34 }
  0xa1   :  { %1698 = vmatmul.msk.f32.gmra.mxu2 %vm235_vm3, %v283_v35 }
  0xa6   :  { %v2177_v36 = vpop.eup %2176  ;;  %v504_v38 = vpop.f32.mrf.mxu0 }
  0xa7   :  { %1694 = vmatmul.msk.f32.gmra.mxu1 %vm235_vm3, %v2177_v36  ;;  %v284_v37 = vmul.f32 %v2177_v36, %v2177_v36 }
  0xa9   :  { %1699 = vmatmul.msk.f32.gmra.mxu2 %vm235_vm3, %v284_v37 }
  0xae   :  { %v506_v39 = vpop.f32.mrf.mxu0  ;;  %v490_v43 = vpop.f32.mrf.mxu3 }
  0xaf   :  { %517 = vmatmul.bf16.vlgmr.msrb.gmra.mxu1 %v2383_v54  ;;  %v524_v40 = vpack.c.bf16 %v506_v39, %v504_v38 }
  0xb1   :  { %569 = vmatpush.bf16.msrb.mxu3 %v524_v40 }
  0xb4   :  { %1806 = vmatmul.msk.bf16.vlgmr.msrb.gmra.mxu3 %vm536_vm4, %v2410_v42 }
  0xb6   :  { %v492_v44 = vpop.f32.mrf.mxu3 }
  0xb7   :  { %v523_v45 = vpack.c.bf16 %v492_v44, %v490_v43 }
  0xb9   :  { %550 = vmatpush.bf16.msrb.mxu2 %v523_v45 }
  0xbc   :  { %1804 = vmatmul.msk.bf16.vlgmr.msrb.gmra.mxu2 %vm536_vm4, %v2410_v42 }
  0xc4   :  { %1807 = vmatmul.msk.bf16.gmra.mxu3 %vm536_vm4, %v2419_v46 }
  0xcc   :  { %1805 = vmatmul.msk.bf16.gmra.mxu2 %vm536_vm4, %v2419_v46 }
 0x10c   :  { %v269_v49 = vpop.f32.mrf.mxu1 }
 0x114   :  { %v272_v50 = vpop.f32.mrf.mxu1  ;;  %v317_v51 = vpop.f32.mrf.mxu2 }
 0x115   :  { %v329_v52 = vmul.f32 0.5, %v317_v51 }
 0x117   :  { %v333_v54 = vsub.f32 %v269_v49, %v329_v52 }
 0x119   :  { %v340_v55 = vsub.f32 %v333_v54, %v2162_v53 }
 0x11b   :  { %v344_v56 = vmul.f32 1.442695, %v340_v55 }
 0x11c   :  { %v275_v57 = vpop.f32.mrf.mxu1  ;;  %v320_v58 = vpop.f32.mrf.mxu2 }
 0x11d   :  { %2178 = vpow2.f32 %v344_v56  ;;  %v330_v59 = vmul.f32 0.5, %v320_v58 }
 0x11f   :  { %v334_v60 = vsub.f32 %v272_v50, %v330_v59 }
 0x121   :  { %v341_v61 = vsub.f32 %v334_v60, %v2162_v53 }
 0x123   :  { %v2179_v62 = vpop.eup %2178  ;;  %v346_v63 = vmul.f32 1.442695, %v341_v61 }
 0x124   :  { %v323_v0 = vpop.f32.mrf.mxu2  ;;  %629 = vperm.xlu2 %2136, %v2179_v62   ;;  %602 = vperm.xlu0 %2135, %v2179_v62   ;;  %v278_v2 = vpop.f32.mrf.mxu1 }
 0x125   :  { %2180 = vpow2.f32 %v346_v63  ;;  %v331_v3 = vmul.f32 0.5, %v323_v0 }
 0x127   :  { %v335_v4 = vsub.f32 %v275_v57, %v331_v3 }
 0x129   :  { %v342_v5 = vsub.f32 %v335_v4, %v2162_v53 }
 0x12b   :  { %v2181_v6 = vpop.eup %2180  ;;  %v348_v7 = vmul.f32 1.442695, %v342_v5 }
 0x12c   :  { %v326_v8 = vpop.f32.mrf.mxu2  ;;  %607 = vperm.xlu1 %2137, %v2181_v6   ;;  %v518_v9 = vpop.f32.mrf.mxu1  ;;  %2139 = vset.pattern.permute.xlu2 %v2278_v10 }
 0x12d   :  { %2182 = vpow2.f32 %v348_v7  ;;  %v332_v11 = vmul.f32 0.5, %v326_v8 }
 0x12f   :  { %v336_v12 = vsub.f32 %v278_v2, %v332_v11  ;;  %v2447_v11 = vld [vmem:[%s2593_s3] sm:$0xff] }
 0x131   :  { %v343_v13 = vsub.f32 %v336_v12, %v2162_v53  ;;  %v1916_v12 = vld [vmem:[#allocation2 + $0x168] sm:$0xf] }
 0x133   :  { %v2183_v14 = vpop.eup %2182  ;;  %v350_v16 = vmul.f32 1.442695, %v343_v13  ;;  %v2100_v13 = vld [vmem:[#allocation2 + $0x170] sm:$0xf0] }
 0x134   :  { %2138 = vset.pattern.permute.xlu1 %v2276_v47  ;;  %661 = vperm.xlu2 %2139, %v2183_v14   ;;  %v520_v17 = vpop.f32.mrf.mxu1 }
 0x135   :  { %2184 = vpow2.f32 %v350_v16  ;;  %612 = vperm.xlu0 %2135, %v2183_v14   ;;  %v525_v18 = vpack.c.bf16 %v520_v17, %v518_v9  ;;  %637 = vperm.xlu1 %2138, %v2183_v14   ;;  %v69_v9 = vld [vmem:[%s2594_s4 + $0x2] sm:$0x3]  ;;  %v2099_v14 = vld [vmem:[#allocation2 + $0x16c] sm:$0xf]  ;;  %v1917_v16 = vor.u32 %v2100_v13, %v1916_v12  ;;  %v1918_v17 = vld [vmem:[#allocation2 + $0x174] sm:$0xf0] }
 0x136   :  { %v2098_v12 = vld [vmem:[#allocation2 + $0x160] sm:$0xf0] }
 0x137   :  { %588 = vmatpush.bf16.msra.mxu0 %v525_v18  ;;  %v571_v21 = vpop.f32.mrf.mxu3  ;;  %v1904_v18 = vld [vmem:[#allocation2 + $0x150] sm:$0xf] }
 0x13a   :  { %1808 = vmatmul.msk.bf16.vlgmr.msra.gmra.mxu0 %vm536_vm4, %v2410_v42 }
 0x13b   :  { %v2185_v19 = vpop.eup %2184  ;;  %987 = vmatpush.bf16.msrb.mxu0 %v1917_v16  ;;  %v1900_v16 = vld [vmem:[#allocation2 + $0x140] sm:$0xf] }
 0x13c   :  { %665 = vperm.xlu2 %2139, %v2185_v19  }
 0x13d   :  { %617 = vperm.xlu0 %2135, %v2185_v19   ;;  %641 = vperm.xlu1 %2138, %v2185_v19   ;;  %v2097_v19 = vld [vmem:[#allocation2 + $0x158] sm:$0xf0] }
 0x13f   :  { %v552_v20 = vpop.f32.mrf.mxu2  ;;  %v573_v27 = vpop.f32.mrf.mxu3 }
 0x144   :  { %657 = vperm.xlu2 %2139, %v2181_v6  }
 0x145   :  { %2140 = vset.pattern.permute.xlu0 %v2276_v47  ;;  %2141 = vset.pattern.permute.xlu1 %v2278_v10 }
 0x146   :  { %633 = vperm.xlu0 %2140, %v2181_v6   ;;  %653 = vperm.xlu1 %2141, %v2179_v62  }
 0x147   :  { %v554_v25 = vpop.f32.mrf.mxu2  ;;  %v576_v33 = vpop.f32.mrf.mxu3 }
 0x14a   :  { %1809 = vmatmul.msk.bf16.gmra.mxu0 %vm536_vm4, %v2419_v46 }
 0x14c   :  { %2144 = vset.pattern.permute.xlu2 %v2277_v48 }
 0x14e   :  { %2142 = vset.pattern.permute.xlu1 %v2277_v48 }
 0x14f   :  { %v557_v32 = vpop.f32.mrf.mxu2  ;;  %v578_v40 = vpop.f32.mrf.mxu3 }
 0x157   :  { %v559_v39 = vpop.f32.mrf.mxu2 }
 0x17e   :  { %v630_v24 = vpop.permute.xlu2 %629 }
 0x17f   :  { %v644_v62 = vmul.f32 %v630_v24, %v571_v21  ;;  %v2096_v21 = vld [vmem:[#allocation2 + $0x154] sm:$0xf]  ;;  %v1892_v24 = vld [vmem:[#allocation2 + $0x138] sm:$0xf] }
 0x18e   :  { %v662_v30 = vpop.permute.xlu2 %661 }
 0x196   :  { %v603_v22 = vpop.permute.xlu0 %602  ;;  %v666_v36 = vpop.permute.xlu2 %665 }
 0x197   :  { %v620_v54 = vmul.f32 %v603_v22, %v552_v20  ;;  %v1921_v20 = vor.u32 %v2099_v14, %v1918_v17  ;;  %v1906_v22 = vld [vmem:[#allocation2 + $0x15c] sm:$0xf0]  ;;  %v2095_v17 = vld [vmem:[#allocation2 + $0x148] sm:$0xf0] }
 0x199   :  { %v648_v4 = vadd.f32 %v644_v62, %v620_v54  ;;  %v1844_v54 = vld [vmem:[#allocation2 + $0xd8] sm:$0xf]  ;;  %v2079_v62 = vld [vmem:[#allocation2 + $0xc8] sm:$0xf0] }
 0x19e   :  { %v608_v23 = vpop.permute.xlu1 %607  ;;  %v658_v51 = vpop.permute.xlu2 %657 }
 0x19f   :  { %v621_v55 = vmul.f32 %v608_v23, %v554_v25  ;;  %v1905_v23 = vor.u32 %v2097_v19, %v1904_v18  ;;  %v2094_v25 = vld [vmem:[#allocation2 + $0x140] sm:$0xf0]  ;;  %v1901_v18 = vor.u32 %v2095_v17, %v1900_v16  ;;  %v1888_v19 = vld [vmem:[#allocation2 + $0x128] sm:$0xf] }
 0x1a1   :  { %988 = vmatpush.bf16.msrb.mxu0 %v1905_v23 }
 0x1a7   :  { %v613_v28 = vpop.permute.xlu0 %612  ;;  %v638_v31 = vpop.permute.xlu1 %637 }
 0x1a8   :  { %v622_v44 = vmul.f32 %v613_v28, %v557_v32  ;;  %v646_v45 = vmul.f32 %v638_v31, %v576_v33  ;;  %v2093_v28 = vld [vmem:[#allocation2 + $0x13c] sm:$0xf]  ;;  %v1880_v31 = vld [vmem:[#allocation2 + $0x120] sm:$0xf]  ;;  %v2091_v32 = vld [vmem:[#allocation2 + $0x128] sm:$0xf0] }
 0x1aa   :  { %v650_v58 = vadd.f32 %v646_v45, %v622_v44 }
 0x1af   :  { %v618_v35 = vpop.permute.xlu0 %617  ;;  %v642_v37 = vpop.permute.xlu1 %641 }
 0x1b0   :  { %v623_v49 = vmul.f32 %v618_v35, %v559_v39  ;;  %v647_v50 = vmul.f32 %v642_v37, %v578_v40  ;;  %v1882_v35 = vld [vmem:[#allocation2 + $0x12c] sm:$0xf0]  ;;  %v1868_v37 = vld [vmem:[#allocation2 + $0x108] sm:$0xf]  ;;  %v2087_v40 = vld [vmem:[#allocation2 + $0x10c] sm:$0xf] }
 0x1b2   :  { %v651_v59 = vadd.f32 %v647_v50, %v623_v49  ;;  %v1856_v49 = vld [vmem:[#allocation2 + $0xf0] sm:$0xf]  ;;  %v2085_v50 = vld [vmem:[#allocation2 + $0xf8] sm:$0xf0] }
 0x1b7   :  { %v590_v29 = vpop.f32.mrf.mxu0 }
 0x1b8   :  { %v634_v43 = vpop.permute.xlu0 %633  ;;  %v654_v56 = vpop.permute.xlu1 %653 }
 0x1b9   :  { %v645_v52 = vmul.f32 %v634_v43, %v573_v27  ;;  %v668_v0 = vmul.f32 %v654_v56, %v590_v29  ;;  %v1909_v27 = vor.u32 %v2096_v21, %v1906_v22  ;;  %v1894_v29 = vld [vmem:[#allocation2 + $0x144] sm:$0xf0]  ;;  %v1870_v43 = vld [vmem:[#allocation2 + $0x114] sm:$0xf0]  ;;  %v2163_v21 = vld [vmem:[%s2600_s10] ss:$0 sm:$0xff] }
 0x1ba   :  { %v1897_v33 = vor.u32 %v2093_v28, %v1894_v29  ;;  %v1873_v45 = vor.u32 %v2087_v40, %v1870_v43  ;;  %v2089_v28 = vld [vmem:[#allocation2 + $0x118] sm:$0xf0]  ;;  %v1840_v40 = vld [vmem:[#allocation2 + $0xc8] sm:$0xf]  ;;  %v2080_v43 = vld [vmem:[#allocation2 + $0xd0] sm:$0xf0] }
 0x1bb   :  { %v649_v63 = vadd.f32 %v645_v52, %v621_v55  ;;  %v672_v7 = vadd.f32 %v668_v0, %v648_v4  ;;  %v1857_v52 = vor.u32 %v2085_v50, %v1856_v49  ;;  %v2082_v55 = vld [vmem:[#allocation2 + $0xe0] sm:$0xf0] }
 0x1bc   :  { %v78_v4 = vld [vmem:[%s2597_s7 + $0x4] sm:$0xf] }
 0x1bd   :  { %1820 = vmatpush.msk.msra.mxu2 %vm248_vm2, %v78_v4 }
 0x1bf   :  { %v592_v34 = vpop.f32.mrf.mxu0 }
 0x1c0   :  { %v669_v60 = vmul.f32 %v658_v51, %v592_v34  ;;  %v2090_v34 = vld [vmem:[#allocation2 + $0x124] sm:$0xf]  ;;  %v2084_v51 = vld [vmem:[#allocation2 + $0xf4] sm:$0xf] }
 0x1c1   :  { %v1885_v39 = vor.u32 %v2090_v34, %v1882_v35 }
 0x1c2   :  { %v673_v5 = vadd.f32 %v669_v60, %v649_v63  ;;  %v2078_v63 = vld [vmem:[#allocation2 + $0xc4] sm:$0xf] }
 0x1c4   :  { %v676_v8 = vpack.c.bf16 %v673_v5, %v672_v7  ;;  %v1924_v5 = vld [vmem:[#allocation2 + $0x170] sm:$0xf] }
 0x1c7   :  { %v595_v38 = vpop.f32.mrf.mxu0 }
 0x1c8   :  { %v670_v53 = vmul.f32 %v662_v30, %v595_v38  ;;  %v1893_v30 = vor.u32 %v2094_v25, %v1892_v24  ;;  %v2088_v38 = vld [vmem:[#allocation2 + $0x110] sm:$0xf0] }
 0x1c9   :  { %v1869_v44 = vor.u32 %v2088_v38, %v1868_v37  ;;  %v1852_v37 = vld [vmem:[#allocation2 + $0xe0] sm:$0xf]  ;;  %v2083_v38 = vld [vmem:[#allocation2 + $0xe8] sm:$0xf0] }
 0x1ca   :  { %v674_v2 = vadd.f32 %v670_v53, %v650_v58  ;;  %989 = vmatpush.bf16.msrb.mxu0 %v1893_v30  ;;  %v1858_v53 = vld [vmem:[#allocation2 + $0xfc] sm:$0xf0]  ;;  %v1846_v58 = vld [vmem:[#allocation2 + $0xe4] sm:$0xf0] }
 0x1cb   :  { %v1861_v56 = vor.u32 %v2084_v51, %v1858_v53 }
 0x1cf   :  { %v597_v57 = vpop.f32.mrf.mxu0 }
 0x1d0   :  { %v671_v61 = vmul.f32 %v666_v36, %v597_v57  ;;  %v1881_v36 = vor.u32 %v2091_v32, %v1880_v31  ;;  %v2081_v57 = vld [vmem:[#allocation2 + $0xdc] sm:$0xf]  ;;  %v1864_v31 = vld [vmem:[#allocation2 + $0xf8] sm:$0xf]  ;;  %v2086_v32 = vld [vmem:[#allocation2 + $0x100] sm:$0xf0] }
 0x1d1   :  { %v1849_v60 = vor.u32 %v2081_v57, %v1846_v58  ;;  %v1865_v34 = vor.u32 %v2086_v32, %v1864_v31 }
 0x1d2   :  { %v675_v3 = vadd.f32 %v671_v61, %v651_v59  ;;  %990 = vmatpush.bf16.msrb.mxu0 %v1881_v36  ;;  %v1845_v59 = vor.u32 %v2082_v55, %v1844_v54  ;;  %v1832_v61 = vld [vmem:[#allocation2 + $0xc0] sm:$0xf] }
 0x1d3   :  { %v1833_v0 = vor.u32 %v2079_v62, %v1832_v61 }
 0x1d4   :  { %v677_v6 = vpack.c.bf16 %v675_v3, %v674_v2  ;;  %v1834_v2 = vld [vmem:[#allocation2 + $0xcc] sm:$0xf0] }
 0x1d5   :  { %v1837_v3 = vor.u32 %v2078_v63, %v1834_v2 }
 0x1d6   :  { %696 = vmatpush.bf16.msra.mxu1 %v677_v6  ;;  %991 = vmatpush.bf16.msrb.mxu0 %v1869_v44  ;;  %v2101_v6 = vld [vmem:[#allocation2 + $0x178] sm:$0xf0]  ;;  %v1841_v44 = vor.u32 %v2080_v43, %v1840_v40 }
 0x1d7   :  { %v1925_v7 = vor.u32 %v2101_v6, %v1924_v5 }
 0x1d9   :  { %1015 = vmatpush.bf16.msrb.mxu2 %v1925_v7 }
 0x1da   :  { %697 = vmatpush.bf16.msra.mxu1 %v676_v8  ;;  %992 = vmatpush.bf16.msrb.mxu0 %v1857_v52  ;;  %v75_v8 = vld [vmem:[%s2596_s6 + $0x4] sm:$0xf] }
 0x1db   :  { %1825 = vmatpush.msk.msra.mxu3 %vm248_vm2, %v75_v8  ;;  %v2165_v8 = vld [vmem:[%s2598_s8 + $0x1] ss:$0 sm:$0xff] }
 0x1dd   :  { %1814 = vmatmul.msk.bf16.vlgmr.msra.gmra.mxu1 %vm686_vm5, %v2447_v11 }
 0x1de   :  { %1815 = vmatpush.msk.msrb.mxu1 %vm198_vm0, %v69_v9  ;;  %993 = vmatpush.bf16.msrb.mxu0 %v1845_v59  ;;  %v1912_v9 = vld [vmem:[#allocation2 + $0x158] sm:$0xf] }
 0x1df   :  { %v1913_v13 = vor.u32 %v2098_v12, %v1912_v9 }
 0x1e0   :  { %1001 = vmatpush.bf16.msra.mxu1 %v1921_v20  ;;  %v2092_v20 = vld [vmem:[#allocation2 + $0x130] sm:$0xf0] }
 0x1e1   :  { %1016 = vmatpush.bf16.msrb.mxu2 %v1913_v13  ;;  %v1889_v22 = vor.u32 %v2092_v20, %v1888_v19 }
 0x1e2   :  { %994 = vmatpush.bf16.msrb.mxu0 %v1833_v0 }
 0x1e4   :  { %1002 = vmatpush.bf16.msra.mxu1 %v1909_v27  ;;  %v1876_v27 = vld [vmem:[#allocation2 + $0x110] sm:$0xf] }
 0x1e5   :  { %1017 = vmatpush.bf16.msrb.mxu2 %v1901_v18  ;;  %v1877_v29 = vor.u32 %v2089_v28, %v1876_v27 }
 0x1e8   :  { %1003 = vmatpush.bf16.msra.mxu1 %v1897_v33  ;;  %v2164_v33 = vld [vmem:[%s2595_s5 + $0x1] ss:$0 sm:$0xff] }
 0x1e9   :  { %1018 = vmatpush.bf16.msrb.mxu2 %v1889_v22 }
 0x1ec   :  { %1004 = vmatpush.bf16.msra.mxu1 %v1885_v39  ;;  %v1853_v39 = vor.u32 %v2083_v38, %v1852_v37 }
 0x1ed   :  { %1816 = vmatmul.msk.f32.vlgmr.msrb.gmra.mxu1 %vm185_vm1, %v2351_v1  ;;  %1019 = vmatpush.bf16.msrb.mxu2 %v1877_v29 }
 0x1f0   :  { %1005 = vmatpush.bf16.msra.mxu1 %v1873_v45 }
 0x1f1   :  { %1020 = vmatpush.bf16.msrb.mxu2 %v1865_v34 }
 0x1f4   :  { %1006 = vmatpush.bf16.msra.mxu1 %v1861_v56 }
 0x1f5   :  { %1817 = vmatmul.msk.f32.gmra.mxu1 %vm185_vm1, %v2359_v15  ;;  %1021 = vmatpush.bf16.msrb.mxu2 %v1853_v39 }
 0x1f8   :  { %1007 = vmatpush.bf16.msra.mxu1 %v1849_v60 }
 0x1f9   :  { %1022 = vmatpush.bf16.msrb.mxu2 %v1841_v44 }
 0x1fc   :  { %1008 = vmatpush.bf16.msra.mxu1 %v1837_v3 }
 0x1fd   :  { %1818 = vmatmul.msk.f32.gmra.mxu1 %vm185_vm1, %v2366_v26 }
 0x205   :  { %1819 = vmatmul.msk.f32.gmra.mxu1 %vm185_vm1, %v2373_v41 }
 0x25a   :  { %v699_v14 = vpop.f32.mrf.mxu1 }
 0x25b   :  { %v700_v24 = vadd.f32 %v2163_v21, %v699_v14 }
 0x262   :  { %v701_v23 = vpop.f32.mrf.mxu1 }
 0x263   :  { %v702_v25 = vadd.f32 %v2163_v21, %v701_v23 }
 0x265   :  { %v858_v30 = vpack.c.bf16 %v702_v25, %v700_v24 }
 0x267   :  { %995 = vmatmul.bf16.vlgmr.msrb.gmra.mxu0 %v858_v30  ;;  %1009 = vmatmul.bf16.vlgmr.msra.gmra.mxu1 %v858_v30 }
 0x26a   :  { %v727_v35 = vpop.f32.mrf.mxu1 }
 0x26b   :  { %v728_v36 = vadd.f32 %v2164_v33, %v727_v35  ;;  %v70_v35 = vld [vmem:[%s2594_s4 + $0x4] sm:$0x3] }
 0x26d   :  { %2186 = vtanh.f32 %v728_v36 }
 0x272   :  { %v730_v45 = vpop.f32.mrf.mxu1 }
 0x273   :  { %v2187_v49 = vpop.eup %2186  ;;  %v731_v50 = vadd.f32 %v2164_v33, %v730_v45 }
 0x274   :  { %v787_v51 = vmul.f32 %v2187_v49, %v2187_v49  ;;  %1821 = vmatmul.msk.f32.vlgmr.msra.gmra.mxu2 %vm235_vm3, %v2187_v49 }
 0x275   :  { %2188 = vtanh.f32 %v731_v50 }
 0x276   :  { %1826 = vmatmul.msk.f32.vlgmr.msra.gmra.mxu3 %vm235_vm3, %v787_v51 }
 0x27a   :  { %v733_v52 = vpop.f32.mrf.mxu1 }
 0x27b   :  { %v2189_v53 = vpop.eup %2188  ;;  %v734_v54 = vadd.f32 %v2164_v33, %v733_v52 }
 0x27c   :  { %1822 = vmatmul.msk.f32.gmra.mxu2 %vm235_vm3, %v2189_v53  ;;  %v788_v55 = vmul.f32 %v2189_v53, %v2189_v53 }
 0x27d   :  { %2190 = vtanh.f32 %v734_v54 }
 0x27e   :  { %1827 = vmatmul.msk.f32.gmra.mxu3 %vm235_vm3, %v788_v55  ;;  %v2166_v55 = vld [vmem:[%s2595_s5 + $0x2] ss:$0 sm:$0xff] }
 0x282   :  { %v736_v56 = vpop.f32.mrf.mxu1 }
 0x283   :  { %v2191_v57 = vpop.eup %2190  ;;  %v737_v58 = vadd.f32 %v2164_v33, %v736_v56 }
 0x284   :  { %1823 = vmatmul.msk.f32.gmra.mxu2 %vm235_vm3, %v2191_v57  ;;  %v789_v59 = vmul.f32 %v2191_v57, %v2191_v57 }
 0x285   :  { %2192 = vtanh.f32 %v737_v58 }
 0x286   :  { %1828 = vmatmul.msk.f32.gmra.mxu3 %vm235_vm3, %v789_v59 }
 0x28b   :  { %v2193_v60 = vpop.eup %2192 }
 0x28c   :  { %1824 = vmatmul.msk.f32.gmra.mxu2 %vm235_vm3, %v2193_v60  ;;  %v790_v61 = vmul.f32 %v2193_v60, %v2193_v60 }
 0x28e   :  { %1829 = vmatmul.msk.f32.gmra.mxu3 %vm235_vm3, %v790_v61 }
 0x294   :  { %1023 = vmatmul.bf16.vlgmr.msrb.gmra.mxu2 %v858_v30 }
 0x2e4   :  { %v996_v62 = vpop.f32.mrf.mxu0  ;;  %v1010_v63 = vpop.f32.mrf.mxu1 }
 0x2ec   :  { %v998_v0 = vpop.f32.mrf.mxu0  ;;  %v1012_v2 = vpop.f32.mrf.mxu1 }
 0x2ed   :  { %v1029_v3 = vpack.c.bf16 %v998_v0, %v996_v62  ;;  %v1030_v4 = vpack.c.bf16 %v1012_v2, %v1010_v63 }
 0x2ef   :  { %1039 = vmatpush.bf16.msra.mxu0 %v1029_v3  ;;  %1058 = vmatpush.bf16.msrb.mxu3 %v1030_v4 }
 0x2f2   :  { %1926 = vmatmul.msk.bf16.vlgmr.msra.gmra.mxu0 %vm536_vm4, %v2410_v42  ;;  %1928 = vmatmul.msk.bf16.vlgmr.msrb.gmra.mxu3 %vm536_vm4, %v2410_v42 }
 0x2f3   :  { %1933 = vmatpush.msk.msrb.mxu0 %vm198_vm0, %v70_v35 }
 0x2f7   :  { %v775_v5 = vpop.f32.mrf.mxu2 }
 0x2f9   :  { %v823_v6 = vpop.f32.mrf.mxu3 }
 0x2fa   :  { %v835_v7 = vmul.f32 0.5, %v823_v6 }
 0x2fc   :  { %v839_v9 = vsub.f32 %v775_v5, %v835_v7 }
 0x2fe   :  { %v846_v12 = vsub.f32 %v839_v9, %v2165_v8 }
 0x2ff   :  { %v778_v13 = vpop.f32.mrf.mxu2 }
 0x300   :  { %v850_v14 = vmul.f32 1.442695, %v846_v12 }
 0x301   :  { %v826_v16 = vpop.f32.mrf.mxu3 }
 0x302   :  { %2194 = vpow2.f32 %v850_v14  ;;  %v836_v17 = vmul.f32 0.5, %v826_v16  ;;  %1927 = vmatmul.msk.bf16.gmra.mxu0 %vm536_vm4, %v2419_v46  ;;  %1929 = vmatmul.msk.bf16.gmra.mxu3 %vm536_vm4, %v2419_v46 }
 0x304   :  { %v840_v18 = vsub.f32 %v778_v13, %v836_v17 }
 0x306   :  { %v847_v19 = vsub.f32 %v840_v18, %v2165_v8 }
 0x307   :  { %v781_v20 = vpop.f32.mrf.mxu2 }
 0x308   :  { %v2195_v21 = vpop.eup %2194  ;;  %v852_v22 = vmul.f32 1.442695, %v847_v19 }
 0x309   :  { %v829_v23 = vpop.f32.mrf.mxu3  ;;  %1091 = vperm.xlu1 %2142, %v2195_v21  }
 0x30a   :  { %2196 = vpow2.f32 %v852_v22  ;;  %v837_v24 = vmul.f32 0.5, %v829_v23 }
 0x30c   :  { %v841_v25 = vsub.f32 %v781_v20, %v837_v24 }
 0x30e   :  { %v848_v27 = vsub.f32 %v841_v25, %v2165_v8 }
 0x30f   :  { %v784_v28 = vpop.f32.mrf.mxu2 }
 0x310   :  { %v2197_v29 = vpop.eup %2196  ;;  %v854_v30 = vmul.f32 1.442695, %v848_v27 }
 0x311   :  { %v832_v31 = vpop.f32.mrf.mxu3  ;;  %2143 = vset.pattern.permute.xlu1 %v2276_v47  ;;  %1096 = vperm.xlu2 %2144, %v2197_v29  }
 0x312   :  { %2198 = vpow2.f32 %v854_v30  ;;  %v838_v32 = vmul.f32 0.5, %v832_v31  ;;  %1118 = vperm.xlu1 %2143, %v2195_v21   ;;  %1934 = vmatmul.msk.f32.vlgmr.msrb.gmra.mxu0 %vm185_vm1, %v2351_v1 }
 0x314   :  { %v842_v33 = vsub.f32 %v784_v28, %v838_v32 }
 0x316   :  { %v849_v34 = vsub.f32 %v842_v33, %v2165_v8 }
 0x317   :  { %v1024_v36 = vpop.f32.mrf.mxu2 }
 0x318   :  { %v2199_v37 = vpop.eup %2198  ;;  %v856_v38 = vmul.f32 1.442695, %v849_v34 }
 0x319   :  { %2146 = vset.pattern.permute.xlu2 %v2278_v10  ;;  %1126 = vperm.xlu0 %2140, %v2199_v37  }
 0x31a   :  { %2200 = vpow2.f32 %v856_v38  ;;  %2145 = vset.pattern.permute.xlu1 %v2277_v48  ;;  %1150 = vperm.xlu2 %2146, %v2199_v37  }
 0x31b   :  { %1101 = vperm.xlu1 %2145, %v2199_v37   ;;  %1935 = vmatmul.msk.f32.gmra.mxu0 %vm185_vm1, %v2359_v15 }
 0x31f   :  { %v1026_v39 = vpop.f32.mrf.mxu2 }
 0x320   :  { %v2201_v40 = vpop.eup %2200  ;;  %v1031_v43 = vpack.c.bf16 %v1026_v39, %v1024_v36 }
 0x321   :  { %2150 = vset.pattern.permute.xlu0 %v2278_v10 }
 0x322   :  { %2147 = vset.pattern.permute.xlu2 %v2277_v48  ;;  %1154 = vperm.xlu0 %2150, %v2201_v40  }
 0x323   :  { %1077 = vmatpush.bf16.msrb.mxu1 %v1031_v43  ;;  %2149 = vset.pattern.permute.xlu1 %v2276_v47 }
 0x324   :  { %1106 = vperm.xlu2 %2147, %v2201_v40   ;;  %1130 = vperm.xlu1 %2149, %v2201_v40   ;;  %v79_v40 = vld [vmem:[%s2597_s7 + $0x8] sm:$0xf] }
 0x325   :  { %1936 = vmatmul.msk.f32.gmra.mxu0 %vm185_vm1, %v2366_v26 }
 0x326   :  { %1930 = vmatmul.msk.bf16.vlgmr.msrb.gmra.mxu1 %vm536_vm4, %v2410_v42 }
 0x32a   :  { %1142 = vperm.xlu0 %2150, %v2195_v21  }
 0x32c   :  { %2148 = vset.pattern.permute.xlu2 %v2276_v47  ;;  %2151 = vset.pattern.permute.xlu1 %v2278_v10 }
 0x32d   :  { %1122 = vperm.xlu2 %2148, %v2197_v29   ;;  %1146 = vperm.xlu1 %2151, %v2197_v29  }
 0x32e   :  { %1937 = vmatmul.msk.f32.gmra.mxu0 %vm185_vm1, %v2373_v41 }
 0x332   :  { %2152 = vset.pattern.permute.xlu0 %v2277_v48 }
 0x335   :  { %2153 = vset.pattern.permute.xlu1 %v2277_v48 }
 0x336   :  { %1931 = vmatmul.msk.bf16.gmra.mxu1 %vm536_vm4, %v2419_v46  ;;  %v76_v46 = vld [vmem:[%s2596_s6 + $0x8] sm:$0xf] }
 0x337   :  { %1943 = vmatpush.msk.msra.mxu3 %vm248_vm2, %v76_v46  ;;  %v2120_v46 = vld [vmem:[#allocation2 + $0x214] sm:$0xf] }
 0x36b   :  { %v1097_v44 = vpop.permute.xlu2 %1096 }
 0x36f   :  { %v1041_v1 = vpop.f32.mrf.mxu0 }
 0x374   :  { %v1151_v51 = vpop.permute.xlu2 %1150 }
 0x375   :  { %v1060_v45 = vpop.f32.mrf.mxu3 }
 0x377   :  { %v1043_v15 = vpop.f32.mrf.mxu0 }
 0x378   :  { %v1110_v16 = vmul.f32 %v1097_v44, %v1043_v15  ;;  %v2124_v15 = vld [vmem:[#allocation2 + $0x230] sm:$0xf0] }
 0x37b   :  { %v1092_v26 = vpop.permute.xlu1 %1091 }
 0x37c   :  { %v1109_v24 = vmul.f32 %v1092_v26, %v1041_v1  ;;  %v2034_v1 = vld [vmem:[#allocation2 + $0x228] sm:$0xf]  ;;  %v2123_v26 = vld [vmem:[#allocation2 + $0x22c] sm:$0xf] }
 0x37d   :  { %v1062_v52 = vpop.f32.mrf.mxu3 }
 0x37e   :  { %v1107_v59 = vpop.permute.xlu2 %1106 }
 0x37f   :  { %v1046_v42 = vpop.f32.mrf.mxu0 }
 0x384   :  { %v1119_v49 = vpop.permute.xlu1 %1118 }
 0x385   :  { %v1065_v60 = vpop.f32.mrf.mxu3  ;;  %v1133_v17 = vmul.f32 %v1119_v49, %v1060_v45  ;;  %v2035_v45 = vor.u32 %v2124_v15, %v2034_v1  ;;  %v2036_v49 = vld [vmem:[#allocation2 + $0x234] sm:$0xf0]  ;;  %v2106_v1 = vld [vmem:[#allocation2 + $0x1a0] sm:$0xf0]  ;;  %v2105_v15 = vld [vmem:[#allocation2 + $0x19c] sm:$0xf] }
 0x387   :  { %v1048_v50 = vpop.f32.mrf.mxu0  ;;  %v1123_v4 = vpop.permute.xlu2 %1122  ;;  %v1137_v31 = vadd.f32 %v1133_v17, %v1109_v24  ;;  %1467 = vmatpush.bf16.msra.mxu1 %v2035_v45  ;;  %v2000_v17 = vld [vmem:[#allocation2 + $0x1ec] sm:$0xf0]  ;;  %v2111_v24 = vld [vmem:[#allocation2 + $0x1cc] sm:$0xf] }
 0x388   :  { %v1134_v9 = vmul.f32 %v1123_v4, %v1062_v52  ;;  %v1112_v12 = vmul.f32 %v1107_v59, %v1048_v50  ;;  %v2042_v50 = vld [vmem:[#allocation2 + $0x230] sm:$0xf]  ;;  %v2122_v59 = vld [vmem:[#allocation2 + $0x220] sm:$0xf0]  ;;  %v2012_v4 = vld [vmem:[#allocation2 + $0x204] sm:$0xf0] }
 0x389   :  { %v2107_v45 = vld [vmem:[#allocation2 + $0x1a8] sm:$0xf0] }
 0x38a   :  { %v1138_v27 = vadd.f32 %v1134_v9, %v1110_v16 }
 0x38b   :  { %v1127_v41 = vpop.permute.xlu0 %1126 }
 0x38c   :  { %v1135_v7 = vmul.f32 %v1127_v41, %v1065_v60  ;;  %v2022_v41 = vld [vmem:[#allocation2 + $0x210] sm:$0xf] }
 0x38d   :  { %v1102_v54 = vpop.permute.xlu1 %1101  ;;  %v1067_v3 = vpop.f32.mrf.mxu3 }
 0x38e   :  { %v1111_v5 = vmul.f32 %v1102_v54, %v1046_v42 }
 0x38f   :  { %v1207_v56 = vpop.f32.mrf.mxu0 }
 0x390   :  { %v1208_v58 = vadd.f32 %v2166_v55, %v1207_v56  ;;  %v1139_v18 = vadd.f32 %v1135_v7, %v1111_v5  ;;  %v2121_v56 = vld [vmem:[#allocation2 + $0x218] sm:$0xf0]  ;;  %v2018_v5 = vld [vmem:[#allocation2 + $0x200] sm:$0xf] }
 0x392   :  { %2202 = vtanh.f32 %v1208_v58  ;;  %v2030_v58 = vld [vmem:[#allocation2 + $0x218] sm:$0xf] }
 0x393   :  { %v2031_v60 = vor.u32 %v2122_v59, %v2030_v58  ;;  %v2167_v58 = vld [vmem:[%s2600_s10 + $0x1] ss:$0 sm:$0xff] }
 0x394   :  { %v1155_v63 = vpop.permute.xlu0 %1154 }
 0x396   :  { %v1131_v61 = vpop.permute.xlu1 %1130 }
 0x397   :  { %v1136_v6 = vmul.f32 %v1131_v61, %v1067_v3  ;;  %v2010_v61 = vld [vmem:[#allocation2 + $0x1f8] sm:$0xf] }
 0x398   :  { %v2526_v62 = vpop.eup %2202  ;;  %v1210_v8 = vpop.f32.mrf.mxu0 }
 0x399   :  { %v1267_v2 = vmul.f32 %v2526_v62, %v2526_v62  ;;  %v1211_v14 = vadd.f32 %v2166_v55, %v1210_v8  ;;  %v1140_v21 = vadd.f32 %v1136_v6, %v1112_v12  ;;  %v2119_v6 = vld [vmem:[#allocation2 + $0x208] sm:$0xf0]  ;;  %v1998_v12 = vld [vmem:[#allocation2 + $0x1e0] sm:$0xf] }
 0x39a   :  { %v2019_v9 = vor.u32 %v2119_v6, %v2018_v5 }
 0x39b   :  { %1944 = vmatmul.msk.f32.vlgmr.msra.gmra.mxu3 %vm235_vm3, %v1267_v2  ;;  %2204 = vtanh.f32 %v1211_v14  ;;  %v2114_v14 = vld [vmem:[#allocation2 + $0x1e4] sm:$0xf] }
 0x39c   :  { %v1143_v25 = vpop.permute.xlu0 %1142 }
 0x39f   :  { %v1147_v19 = vpop.permute.xlu1 %1146 }
 0x3a1   :  { %v2531_v35 = vpop.eup %2204 }
 0x3a2   :  { %v1213_v34 = vpop.f32.mrf.mxu0  ;;  %v1268_v38 = vmul.f32 %v2531_v35, %v2531_v35 }
 0x3a3   :  { %v1079_v53 = vpop.f32.mrf.mxu1  ;;  %v1214_v37 = vadd.f32 %v2166_v55, %v1213_v34  ;;  %v2108_v34 = vld [vmem:[#allocation2 + $0x1b4] sm:$0xf] }
 0x3a4   :  { %v1157_v28 = vmul.f32 %v1143_v25, %v1079_v53  ;;  %1945 = vmatmul.msk.f32.gmra.mxu3 %vm235_vm3, %v1268_v38  ;;  %v2039_v53 = vor.u32 %v2123_v26, %v2036_v49  ;;  %v1988_v25 = vld [vmem:[#allocation2 + $0x1d4] sm:$0xf0]  ;;  %v2110_v38 = vld [vmem:[#allocation2 + $0x1c0] sm:$0xf0] }
 0x3a5   :  { %2206 = vtanh.f32 %v1214_v37  ;;  %v1982_v37 = vld [vmem:[#allocation2 + $0x1b8] sm:$0xf] }
 0x3a6   :  { %v1161_v36 = vadd.f32 %v1157_v28, %v1137_v31  ;;  %1481 = vmatpush.bf16.msra.mxu0 %v2039_v53  ;;  %v2113_v28 = vld [vmem:[#allocation2 + $0x1d8] sm:$0xf0] }
 0x3ab   :  { %v1081_v57 = vpop.f32.mrf.mxu1  ;;  %v1216_v43 = vpop.f32.mrf.mxu0 }
 0x3ac   :  { %v1158_v22 = vmul.f32 %v1147_v19, %v1081_v57  ;;  %v2542_v42 = vpop.eup %2206  ;;  %v1217_v44 = vadd.f32 %v2166_v55, %v1216_v43  ;;  %v2024_v57 = vld [vmem:[#allocation2 + $0x21c] sm:$0xf0]  ;;  %v2116_v19 = vld [vmem:[#allocation2 + $0x1f0] sm:$0xf0]  ;;  %v1962_v43 = vld [vmem:[#allocation2 + $0x198] sm:$0xf] }
 0x3ad   :  { %v1269_v52 = vmul.f32 %v2542_v42, %v2542_v42  ;;  %v2027_v55 = vor.u32 %v2120_v46, %v2024_v57  ;;  %v1963_v26 = vor.u32 %v2106_v1, %v1962_v43 }
 0x3ae   :  { %v1162_v32 = vadd.f32 %v1158_v22, %v1138_v27  ;;  %2208 = vtanh.f32 %v1217_v44  ;;  %v2112_v22 = vld [vmem:[#allocation2 + $0x1d0] sm:$0xf0]  ;;  %v1994_v27 = vld [vmem:[#allocation2 + $0x1d0] sm:$0xf]  ;;  %v1970_v44 = vld [vmem:[#allocation2 + $0x1a0] sm:$0xf] }
 0x3af   :  { %1946 = vmatmul.msk.f32.gmra.mxu3 %vm235_vm3, %v1269_v52  ;;  %1482 = vmatpush.bf16.msra.mxu0 %v2027_v55  ;;  %v1995_v31 = vor.u32 %v2113_v28, %v1994_v27  ;;  %v1971_v49 = vor.u32 %v2107_v45, %v1970_v44  ;;  %v2102_v52 = vld [vmem:[#allocation2 + $0x184] sm:$0xf] }
 0x3b0   :  { %v1165_v39 = vpack.c.bf16 %v1162_v32, %v1161_v36  ;;  %v1974_v32 = vld [vmem:[#allocation2 + $0x1b0] sm:$0xf] }
 0x3b3   :  { %v1084_v0 = vpop.f32.mrf.mxu1 }
 0x3b4   :  { %v1159_v13 = vmul.f32 %v1151_v51, %v1084_v0  ;;  %v2125_v51 = vld [vmem:[#allocation2 + $0x238] sm:$0xf0]  ;;  %v2209_v2 = vpop.eup %2208 }
 0x3b5   :  { %v2043_v54 = vor.u32 %v2125_v51, %v2042_v50  ;;  %v2117_v0 = vld [vmem:[#allocation2 + $0x1fc] sm:$0xf]  ;;  %v1270_v7 = vmul.f32 %v2209_v2, %v2209_v2  ;;  %v1950_v50 = vld [vmem:[#allocation2 + $0x180] sm:$0xf]  ;;  %v2103_v51 = vld [vmem:[#allocation2 + $0x188] sm:$0xf0] }
 0x3b6   :  { %v1163_v29 = vadd.f32 %v1159_v13, %v1139_v18  ;;  %v2015_v8 = vor.u32 %v2117_v0, %v2012_v4  ;;  %v2115_v13 = vld [vmem:[#allocation2 + $0x1e8] sm:$0xf0]  ;;  %v2006_v18 = vld [vmem:[#allocation2 + $0x1e8] sm:$0xf]  ;;  %v1951_v53 = vor.u32 %v2103_v51, %v1950_v50 }
 0x3b7   :  { %v1999_v16 = vor.u32 %v2115_v13, %v1998_v12  ;;  %1947 = vmatmul.msk.f32.gmra.mxu3 %vm235_vm3, %v1270_v7 }
 0x3b8   :  { %1483 = vmatpush.bf16.msra.mxu0 %v2015_v8 }
 0x3bb   :  { %v1086_v20 = vpop.f32.mrf.mxu1 }
 0x3bc   :  { %v1160_v23 = vmul.f32 %v1155_v63, %v1086_v20  ;;  %v2118_v63 = vld [vmem:[#allocation2 + $0x200] sm:$0xf0]  ;;  %v2003_v20 = vor.u32 %v2114_v14, %v2000_v17 }
 0x3bd   :  { %v2011_v3 = vor.u32 %v2118_v63, %v2010_v61 }
 0x3be   :  { %v1164_v30 = vadd.f32 %v1160_v23, %v1140_v21  ;;  %v1986_v21 = vld [vmem:[#allocation2 + $0x1c8] sm:$0xf]  ;;  %v2007_v23 = vor.u32 %v2116_v19, %v2006_v18  ;;  %1484 = vmatpush.bf16.msra.mxu0 %v2003_v20 }
 0x3c0   :  { %v1166_v33 = vpack.c.bf16 %v1164_v30, %v1163_v29  ;;  %v1987_v29 = vor.u32 %v2112_v22, %v1986_v21  ;;  %v1991_v30 = vor.u32 %v2111_v24, %v1988_v25 }
 0x3c2   :  { %1176 = vmatpush.bf16.msra.mxu2 %v1166_v33  ;;  %1485 = vmatpush.bf16.msra.mxu0 %v1991_v30  ;;  %v2109_v33 = vld [vmem:[#allocation2 + $0x1b8] sm:$0xf0] }
 0x3c3   :  { %v1975_v36 = vor.u32 %v2109_v33, %v1974_v32 }
 0x3c6   :  { %1177 = vmatpush.bf16.msra.mxu2 %v1165_v39 }
 0x3c9   :  { %1932 = vmatmul.msk.bf16.vlgmr.msra.gmra.mxu2 %vm686_vm5, %v2447_v11  ;;  %v2023_v11 = vor.u32 %v2121_v56, %v2022_v41  ;;  %v1958_v41 = vld [vmem:[#allocation2 + $0x188] sm:$0xf]  ;;  %v2104_v56 = vld [vmem:[#allocation2 + $0x190] sm:$0xf0] }
 0x3ca   :  { %1938 = vmatpush.msk.msrb.mxu2 %vm248_vm2, %v79_v40  ;;  %v1983_v40 = vor.u32 %v2110_v38, %v1982_v37 }
 0x3cb   :  { %1468 = vmatpush.bf16.msra.mxu1 %v2023_v11  ;;  %v1959_v11 = vor.u32 %v2104_v56, %v1958_v41 }
 0x3cc   :  { %1495 = vmatpush.bf16.msra.mxu2 %v2043_v54  ;;  %v1952_v54 = vld [vmem:[#allocation2 + $0x18c] sm:$0xf0] }
 0x3cd   :  { %v1955_v46 = vor.u32 %v2102_v52, %v1952_v54 }
 0x3cf   :  { %1469 = vmatpush.bf16.msra.mxu1 %v2011_v3 }
 0x3d0   :  { %1496 = vmatpush.bf16.msra.mxu2 %v2031_v60 }
 0x3d3   :  { %1470 = vmatpush.bf16.msra.mxu1 %v1999_v16 }
 0x3d4   :  { %1497 = vmatpush.bf16.msra.mxu2 %v2019_v9 }
 0x3d7   :  { %1471 = vmatpush.bf16.msra.mxu1 %v1987_v29 }
 0x3d8   :  { %1498 = vmatpush.bf16.msra.mxu2 %v2007_v23 }
 0x3d9   :  { %1939 = vmatmul.msk.f32.vlgmr.msrb.gmra.mxu2 %vm235_vm3, %v2526_v62  ;;  %v1976_v62 = vld [vmem:[#allocation2 + $0x1bc] sm:$0xf0] }
 0x3da   :  { %v1979_v39 = vor.u32 %v2108_v34, %v1976_v62 }
 0x3db   :  { %1472 = vmatpush.bf16.msra.mxu1 %v1975_v36 }
 0x3dc   :  { %1499 = vmatpush.bf16.msra.mxu2 %v1995_v31  ;;  %1486 = vmatpush.bf16.msra.mxu0 %v1979_v39  ;;  %v2218_v39 = vld [vmem:[%s2592_s2] sm:$0xff] }
 0x3df   :  { %1473 = vmatpush.bf16.msra.mxu1 %v1963_v26 }
 0x3e0   :  { %1500 = vmatpush.bf16.msra.mxu2 %v1983_v40 }
 0x3e1   :  { %1940 = vmatmul.msk.f32.gmra.mxu2 %vm235_vm3, %v2531_v35  ;;  %v1964_v35 = vld [vmem:[#allocation2 + $0x1a4] sm:$0xf0] }
 0x3e3   :  { %1474 = vmatpush.bf16.msra.mxu1 %v1951_v53 }
 0x3e4   :  { %1501 = vmatpush.bf16.msra.mxu2 %v1971_v49 }
 0x3e8   :  { %1502 = vmatpush.bf16.msra.mxu2 %v1959_v11 }
 0x3e9   :  { %1941 = vmatmul.msk.f32.gmra.mxu2 %vm235_vm3, %v2542_v42  ;;  %v1967_v42 = vor.u32 %v2105_v15, %v1964_v35 }
 0x3eb   :  { %1487 = vmatpush.bf16.msra.mxu0 %v1967_v42 }
 0x3ef   :  { %1488 = vmatpush.bf16.msra.mxu0 %v1955_v46 }
 0x3f1   :  { %1942 = vmatmul.msk.f32.gmra.mxu2 %vm235_vm3, %v2209_v2  ;;  %v2168_v2 = vld [vmem:[%s2598_s8 + $0x2] ss:$0 sm:$0xff] }
 0x41e   :  { %v1303_v55 = vpop.f32.mrf.mxu3 }
 0x41f   :  { %v1315_v0 = vmul.f32 0.5, %v1303_v55 }
 0x427   :  { %v1306_v4 = vpop.f32.mrf.mxu3 }
 0x428   :  { %v1316_v8 = vmul.f32 0.5, %v1306_v4 }
 0x432   :  { %v1309_v13 = vpop.f32.mrf.mxu3 }
 0x433   :  { %v1317_v18 = vmul.f32 0.5, %v1309_v13 }
 0x43a   :  { %v1312_v25 = vpop.f32.mrf.mxu3 }
 0x43b   :  { %v1318_v27 = vmul.f32 0.5, %v1312_v25  ;;  %v2220_v25 = vld [vmem:[%s2593_s3] sm:$0xff]  ;;  %s2280_s3 = smov 128  }
 0x44c   :  { %v1179_v57 = vpop.f32.mrf.mxu2 }
 0x44d   :  { %v1180_v60 = vadd.f32 %v2167_v58, %v1179_v57 }
 0x454   :  { %v1181_v59 = vpop.f32.mrf.mxu2 }
 0x455   :  { %v1182_v61 = vadd.f32 %v2167_v58, %v1181_v59 }
 0x457   :  { %v1338_v63 = vpack.c.bf16 %v1182_v61, %v1180_v60 }
 0x459   :  { %1475 = vmatmul.bf16.vlgmr.msra.gmra.mxu1 %v1338_v63  ;;  %1489 = vmatmul.bf16.vlgmr.msra.gmra.mxu0 %v1338_v63 }
 0x45a   :  { %1503 = vmatmul.bf16.vlgmr.msra.gmra.mxu2 %v1338_v63 }
 0x45c   :  { %v1255_v3 = vpop.f32.mrf.mxu2 }
 0x45d   :  { %v1319_v5 = vsub.f32 %v1255_v3, %v1315_v0 }
 0x45f   :  { %v1326_v6 = vsub.f32 %v1319_v5, %v2168_v2 }
 0x461   :  { %v1330_v7 = vmul.f32 1.442695, %v1326_v6 }
 0x463   :  { %2210 = vpow2.f32 %v1330_v7 }
 0x464   :  { %v1258_v9 = vpop.f32.mrf.mxu2 }
 0x465   :  { %v1320_v12 = vsub.f32 %v1258_v9, %v1316_v8 }
 0x467   :  { %v1327_v14 = vsub.f32 %v1320_v12, %v2168_v2 }
 0x469   :  { %v2211_v16 = vpop.eup %2210  ;;  %v1332_v17 = vmul.f32 1.442695, %v1327_v14 }
 0x46a   :  { %1598 = vperm.xlu2 %2148, %v2211_v16   ;;  %1571 = vperm.xlu0 %2152, %v2211_v16  }
 0x46b   :  { %2212 = vpow2.f32 %v1332_v17 }
 0x46c   :  { %v1261_v19 = vpop.f32.mrf.mxu2 }
 0x46d   :  { %v1321_v20 = vsub.f32 %v1261_v19, %v1317_v18 }
 0x46f   :  { %v1328_v21 = vsub.f32 %v1321_v20, %v2168_v2 }
 0x471   :  { %v2213_v22 = vpop.eup %2212  ;;  %v1334_v23 = vmul.f32 1.442695, %v1328_v21 }
 0x472   :  { %1576 = vperm.xlu1 %2153, %v2213_v22   ;;  %2154 = vset.pattern.permute.xlu2 %v2277_v48 }
 0x473   :  { %2214 = vpow2.f32 %v1334_v23 }
 0x474   :  { %v1264_v28 = vpop.f32.mrf.mxu2 }
 0x475   :  { %v1322_v29 = vsub.f32 %v1264_v28, %v1318_v27  ;;  %v2169_v27 = vld [vmem:[%s2600_s10 + $0x2] ss:$0 sm:$0xff] }
 0x477   :  { %v1329_v30 = vsub.f32 %v1322_v29, %v2168_v2 }
 0x479   :  { %v2215_v24 = vpop.eup %2214  ;;  %v1336_v31 = vmul.f32 1.442695, %v1329_v30 }
 0x47a   :  { %2155 = vset.pattern.permute.xlu1 %v2276_v47  ;;  %1581 = vperm.xlu2 %2154, %v2215_v24  }
 0x47b   :  { %1606 = vperm.xlu1 %2155, %v2215_v24   ;;  %2216 = vpow2.f32 %v1336_v31 }
 0x481   :  { %v2217_v48 = vpop.eup %2216 }
 0x482   :  { %2157 = vset.pattern.permute.xlu2 %v2276_v47  ;;  %1586 = vperm.xlu0 %2152, %v2217_v48  }
 0x483   :  { %2156 = vset.pattern.permute.xlu1 %v2278_v10  ;;  %1610 = vperm.xlu2 %2157, %v2217_v48  }
 0x484   :  { %1630 = vperm.xlu1 %2156, %v2215_v24  }
 0x48a   :  { %2159 = vset.pattern.permute.xlu0 %v2276_v47 }
 0x48b   :  { %2158 = vset.pattern.permute.xlu2 %v2278_v10  ;;  %1602 = vperm.xlu0 %2159, %v2213_v22  }
 0x48c   :  { %1622 = vperm.xlu1 %2156, %v2211_v16   ;;  %1634 = vperm.xlu2 %2158, %v2217_v48  }
 0x493   :  { %2160 = vset.pattern.permute.xlu0 %v2278_v10  ;;  %v2219_v10 = vld [vmem:[%s2592_s2 + $0x8] sm:$0xff] }
 0x494   :  { %1626 = vperm.xlu2 %2158, %v2213_v22  }
 0x4c4   :  { %v1599_v43 = vpop.permute.xlu2 %1598 }
 0x4d4   :  { %v1582_v15 = vpop.permute.xlu2 %1581 }
 0x4d6   :  { %v1476_v32 = vpop.f32.mrf.mxu1  ;;  %v1490_v33 = vpop.f32.mrf.mxu0 }
 0x4dc   :  { %v1572_v45 = vpop.permute.xlu0 %1571 }
 0x4dd   :  { %v1504_v34 = vpop.f32.mrf.mxu2  ;;  %v1611_v49 = vpop.permute.xlu2 %1610 }
 0x4de   :  { %v1478_v36 = vpop.f32.mrf.mxu1  ;;  %v1492_v62 = vpop.f32.mrf.mxu0 }
 0x4df   :  { %v1509_v37 = vpack.c.bf16 %v1478_v36, %v1476_v32  ;;  %v1510_v38 = vpack.c.bf16 %v1492_v62, %v1490_v33 }
 0x4e1   :  { %1519 = vmatpush.bf16.msrb.mxu1 %v1509_v37  ;;  %1538 = vmatpush.bf16.msrb.mxu3 %v1510_v38 }
 0x4e4   :  { %2044 = vmatmul.msk.bf16.vlgmr.msrb.gmra.mxu1 %vm536_vm4, %v2218_v39  ;;  %2046 = vmatmul.msk.bf16.vlgmr.msrb.gmra.mxu3 %vm536_vm4, %v2218_v39  ;;  %v1577_v26 = vpop.permute.xlu1 %1576 }
 0x4e5   :  { %v1506_v47 = vpop.f32.mrf.mxu2 }
 0x4e6   :  { %v1511_v40 = vpack.c.bf16 %v1506_v47, %v1504_v34  ;;  %v1635_v46 = vpop.permute.xlu2 %1634 }
 0x4e8   :  { %1557 = vmatpush.bf16.msrb.mxu0 %v1511_v40 }
 0x4eb   :  { %2048 = vmatmul.msk.bf16.vlgmr.msrb.gmra.mxu0 %vm536_vm4, %v2218_v39 }
 0x4ed   :  { %v1607_v52 = vpop.permute.xlu1 %1606 }
 0x4ee   :  { %v1627_v13 = vpop.permute.xlu2 %1626 }
 0x4f4   :  { %2045 = vmatmul.msk.bf16.gmra.mxu1 %vm536_vm4, %v2219_v10  ;;  %2047 = vmatmul.msk.bf16.gmra.mxu3 %vm536_vm4, %v2219_v10  ;;  %v1587_v53 = vpop.permute.xlu0 %1586 }
 0x4f6   :  { %v1631_v11 = vpop.permute.xlu1 %1630 }
 0x4fb   :  { %2049 = vmatmul.msk.bf16.gmra.mxu0 %vm536_vm4, %v2219_v10 }
 0x4fd   :  { %v1603_v58 = vpop.permute.xlu0 %1602 }
 0x4fe   :  { %v1623_v19 = vpop.permute.xlu1 %1622 }
 0x561   :  { %v1521_v1 = vpop.f32.mrf.mxu1 }
 0x562   :  { %v1589_v6 = vmul.f32 %v1572_v45, %v1521_v1 }
 0x567   :  { %v1540_v35 = vpop.f32.mrf.mxu3 }
 0x568   :  { %v1559_v44 = vpop.f32.mrf.mxu0  ;;  %v1613_v61 = vmul.f32 %v1599_v43, %v1540_v35 }
 0x569   :  { %v1523_v42 = vpop.f32.mrf.mxu1  ;;  %v1637_v20 = vmul.f32 %v1623_v19, %v1559_v44 }
 0x56a   :  { %v1590_v0 = vmul.f32 %v1577_v26, %v1523_v42  ;;  %v1617_v14 = vadd.f32 %v1613_v61, %v1589_v6 }
 0x56c   :  { %v1641_v23 = vadd.f32 %v1637_v20, %v1617_v14 }
 0x56f   :  { %v1542_v50 = vpop.f32.mrf.mxu3 }
 0x570   :  { %v1561_v51 = vpop.f32.mrf.mxu0  ;;  %v1614_v55 = vmul.f32 %v1603_v58, %v1542_v50 }
 0x571   :  { %v1526_v54 = vpop.f32.mrf.mxu1  ;;  %v1638_v16 = vmul.f32 %v1627_v13, %v1561_v51 }
 0x572   :  { %v1591_v60 = vmul.f32 %v1582_v15, %v1526_v54  ;;  %v1618_v7 = vadd.f32 %v1614_v55, %v1590_v0 }
 0x574   :  { %v1642_v21 = vadd.f32 %v1638_v16, %v1618_v7 }
 0x576   :  { %v1645_v24 = vpack.c.bf16 %v1642_v21, %v1641_v23 }
 0x577   :  { %v1545_v41 = vpop.f32.mrf.mxu3 }
 0x578   :  { %v1564_v56 = vpop.f32.mrf.mxu0  ;;  %v1615_v57 = vmul.f32 %v1607_v52, %v1545_v41 }
 0x579   :  { %v1528_v59 = vpop.f32.mrf.mxu1  ;;  %v1639_v8 = vmul.f32 %v1631_v11, %v1564_v56 }
 0x57a   :  { %v1619_v2 = vadd.f32 %v1615_v57, %v1591_v60  ;;  %v1592_v3 = vmul.f32 %v1587_v53, %v1528_v59 }
 0x57c   :  { %v1643_v17 = vadd.f32 %v1639_v8, %v1619_v2 }
 0x57f   :  { %v1547_v63 = vpop.f32.mrf.mxu3 }
 0x580   :  { %v1616_v4 = vmul.f32 %v1611_v49, %v1547_v63  ;;  %v1566_v5 = vpop.f32.mrf.mxu0 }
 0x581   :  { %v1640_v12 = vmul.f32 %v1635_v46, %v1566_v5 }
 0x582   :  { %v1620_v9 = vadd.f32 %v1616_v4, %v1592_v3 }
 0x584   :  { %v1644_v18 = vadd.f32 %v1640_v12, %v1620_v9 }
 0x586   :  { %v1646_v22 = vpack.c.bf16 %v1644_v18, %v1643_v17 }
 0x588   :  { %1656 = vmatpush.bf16.msrb.mxu2 %v1646_v22 }
 0x58c   :  { %1657 = vmatpush.bf16.msrb.mxu2 %v1645_v24 }
 0x58f   :  { %2050 = vmatmul.msk.bf16.vlgmr.msrb.gmra.mxu2 %vm686_vm5, %v2220_v25 }
 0x612   :  { %v1659_v28 = vpop.f32.mrf.mxu2 }
 0x613   :  { %v1660_v29 = vadd.f32 %v2169_v27, %v1659_v28 }
 0x615   :  { %1664 = vst [vmem:[#allocation5] sm:$0xff] %v1660_v29 }
 0x61a   :  { %v1661_v30 = vpop.f32.mrf.mxu2 }
 0x61b   :  { %v1662_v31 = vadd.f32 %v2169_v27, %v1661_v30 }
 0x61d   :  { %1665 = vst [vmem:[#allocation5 + $0x8] sm:$0xff] %v1662_v31 }
 0x61e   :  { %1678 = dma.vmem_to_hbm [thread:$0]  %s1671_s15, 256, %s1673_s17, [#allocation4], %s2280_s3, %s2280_s3, %s2281_s18  }
 0x61f   :  { %2271 = dma.done.wait [#allocation4], 256  }
 0x620   :  { %2272 = vsyncadd [#allocation4], 4294967040 }
 0x621   :  { %1683 = vsyncpa [#allocation3], 1 }
 0x622   :  { %1684 = vsyncpa [#allocation4], 1 }

</bundles_post_ra>
